<compile_context>
chip_gen: v7x
topology: tpu7x:2x2x1
jax: 0.10.0
libtpu: 0.0.40
codegen_flags: <defaults>
</compile_context>

<pallas_src>
import functools

import jax
import jax.numpy as jnp
from jax.experimental import pallas as pl
from jax.experimental.pallas import tpu as pltpu


# ----------------------------- helpers --------------------------------------
def _pick_time_chunk(seq_len, batch, max_chunk=32):
    """Time steps per grid iteration.

    Whole sequence if it is short; otherwise the largest divisor of T
    (<= max_chunk) whose flattened row count (tt * B) stays sublane-aligned.
    """
    if seq_len <= max_chunk:
        return seq_len
    for cand in range(max_chunk, 0, -1):
        if seq_len % cand == 0 and (cand * batch) % 8 == 0:
            return cand
    return seq_len


# ----------------------- fused per-layer LSTM kernel ------------------------
def lstm_layer_kernel(x_ref, wih_ref, whh_ref, bias_ref, out_ref,
                      h_scr, c_scr, *, hidden_size, chunk, batch, seq_out):
    """Process `chunk` time steps of one LSTM layer.

    x_ref    : (chunk*batch, d_in)  flattened time-major inputs for the chunk
    wih_ref  : (d_in, 4H)           resident VMEM weight (input projection)
    whh_ref  : (H, 4H)              resident VMEM weight (recurrence)
    bias_ref : (1, 4H)              pre-summed b_ih + b_hh
    out_ref  : (chunk, batch, H) if seq_out else (batch, H)
    h_scr/c_scr : (batch, H)        state carried across grid iterations
    """
    H = hidden_size

    @pl.when(pl.program_id(0) == 0)
    def _():
        h_scr[...] = jnp.zeros_like(h_scr)
        c_scr[...] = jnp.zeros_like(c_scr)

    # Hoisted input projection for the whole chunk: one MXU-friendly matmul,
    # result stays in vregs (no HBM round trip of the gates).
    gx = (jnp.dot(x_ref[...], wih_ref[...],
                  preferred_element_type=jnp.float32)
          + bias_ref[...])                      # (chunk*B, 4H)

    whh = whh_ref[...]                          # (H, 4H) resident weight
    h = h_scr[...]
    c = c_scr[...]

    # Static unroll of the recurrence: only ONE matmul per time step remains
    # on the serial dependency chain.
    for t in range(chunk):
        gates = gx[t * batch:(t + 1) * batch, :] + jnp.dot(
            h, whh, preferred_element_type=jnp.float32)
        ingate = jax.nn.sigmoid(gates[:, 0 * H:1 * H])
        forgetgate = jax.nn.sigmoid(gates[:, 1 * H:2 * H])
        cellgate = jnp.tanh(gates[:, 2 * H:3 * H])
        outgate = jax.nn.sigmoid(gates[:, 3 * H:4 * H])
        c = forgetgate * c + ingate * cellgate
        h = outgate * jnp.tanh(c)
        if seq_out:
            out_ref[t] = h                      # static, tile-aligned store

    h_scr[...] = h
    c_scr[...] = c

    if not seq_out:
        # Last layer: only the final hidden state is needed. Constant output
        # block index => single HBM writeback at the end of the grid.
        out_ref[...] = h


def lstm_layer(x_seq, w_ih, w_hh, b_ih, b_hh, *, seq_out, max_chunk=32):
    """Run one LSTM layer over the whole sequence.

    Returns the (T, B, H) hidden sequence if seq_out else the final (B, H)
    hidden state.
    """
    T, B, d_in = x_seq.shape
    H = w_ih.shape[0] // 4

    wih_t = jnp.transpose(w_ih)                 # (d_in, 4H)
    whh_t = jnp.transpose(w_hh)                 # (H, 4H)
    bias = (b_ih + b_hh).reshape(1, 4 * H)      # pre-summed biases

    tt = _pick_time_chunk(T, B, max_chunk)
    x2d = x_seq.reshape(T * B, d_in)            # row-major collapse (free)

    kern = functools.partial(lstm_layer_kernel, hidden_size=H, chunk=tt,
                             batch=B, seq_out=seq_out)

    if seq_out:
        out_shape = jax.ShapeDtypeStruct((T, B, H), jnp.float32)
        out_spec = pl.BlockSpec((tt, B, H), lambda tc: (tc, 0, 0))
    else:
        out_shape = jax.ShapeDtypeStruct((B, H), jnp.float32)
        out_spec = pl.BlockSpec((B, H), lambda tc: (0, 0))

    return pl.pallas_call(
        kern,
        out_shape=out_shape,
        grid_spec=pltpu.PrefetchScalarGridSpec(
            num_scalar_prefetch=0,
            grid=(T // tt,),
            in_specs=[
                # Per-chunk flattened inputs.
                pl.BlockSpec((tt * B, d_in), lambda tc: (tc, 0)),
                # Weights / bias: single resident VMEM copy (no re-fetch,
                # no double-buffering of constants).
                pl.BlockSpec(memory_space=pltpu.MemorySpace.VMEM),
                pl.BlockSpec(memory_space=pltpu.MemorySpace.VMEM),
                pl.BlockSpec(memory_space=pltpu.MemorySpace.VMEM),
            ],
            out_specs=out_spec,
            scratch_shapes=[
                pltpu.VMEM((B, H), jnp.float32),   # h state
                pltpu.VMEM((B, H), jnp.float32),   # c state
            ],
        ),
        compiler_params=pltpu.CompilerParams(
            dimension_semantics=("arbitrary",)),   # serial recurrence in time
    )(x2d, wih_t, whh_t, bias)


def lstm_forward(inputs, params, num_layers):
    """Matches LSTM.forward: returns state_h[num_layers - 1] after all steps.

    Layer j's hoisted input projection needs layer j-1's full output
    sequence, so layers are run as separate (fused) pallas_calls.
    """
    cur = inputs
    for j in range(num_layers):
        w_ih, w_hh, b_ih, b_hh = params[j]
        last = (j == num_layers - 1)
        cur = lstm_layer(cur, w_ih, w_hh, b_ih, b_hh, seq_out=not last)
    return cur                                  # (B, H)


lstm_forward_jit = jax.jit(lstm_forward, static_argnums=(2,))


# ---------------- pure-JAX reference (mirrors the PyTorch module) -----------
def lstm_reference(inputs, params, num_layers, batch_size, hidden_size):
    state_c = [jnp.zeros((batch_size, hidden_size)) for _ in range(num_layers)]
    state_h = [jnp.zeros((batch_size, hidden_size)) for _ in range(num_layers)]
    T = inputs.shape[0]
    H = hidden_size
    for i in range(T):
        cur = inputs[i]
        for j in range(num_layers):
            w_ih, w_hh, b_ih, b_hh = params[j]
            gates = cur @ w_ih.T + b_ih + state_h[j] @ w_hh.T + b_hh
            ig = jax.nn.sigmoid(gates[:, 0 * H:1 * H])
            fg = jax.nn.sigmoid(gates[:, 1 * H:2 * H])
            cg = jnp.tanh(gates[:, 2 * H:3 * H])
            og = jax.nn.sigmoid(gates[:, 3 * H:4 * H])
            cy = fg * state_c[j] + ig * cg
            hy = og * jnp.tanh(cy)
            state_c[j] = cy
            state_h[j] = hy
            cur = hy
    return state_h[num_layers - 1]


if __name__ == "__main__":
    # Small shapes consistent with the module.
    seq_len = 8
    batch_size = 2
    input_size = 16
    hidden_size = 32
    num_layers = 2

    key = jax.random.PRNGKey(0)

    # Deterministic parameter init (mimicking torch.randn in __init__).
    # Note: the PyTorch module constructs num_layers + 1 cells but forward
    # only uses the first num_layers; we only build the cells that are used.
    params = []
    for j in range(num_layers):
        d_in = input_size if j == 0 else hidden_size
        key, k1, k2, k3, k4 = jax.random.split(key, 5)
        w_ih = jax.random.normal(k1, (4 * hidden_size, d_in), jnp.float32)
        w_hh = jax.random.normal(k2, (4 * hidden_size, hidden_size), jnp.float32)
        b_ih = jax.random.normal(k3, (4 * hidden_size,), jnp.float32)
        b_hh = jax.random.normal(k4, (4 * hidden_size,), jnp.float32)
        params.append((w_ih, w_hh, b_ih, b_hh))

    key, kx = jax.random.split(key)
    inputs = jax.random.normal(kx, (seq_len, batch_size, input_size), jnp.float32)

    out = lstm_forward_jit(inputs, params, num_layers)
    out = jax.block_until_ready(out)

    ref = lstm_reference(inputs, params, num_layers, batch_size, hidden_size)
    assert out.shape == (batch_size, hidden_size)
    assert jnp.allclose(out, ref, atol=1e-4, rtol=1e-4), "mismatch vs reference"

    print("KERNEL_OK")
</pallas_src>

<mosaic_0001>
module attributes {stable_mosaic.version = 11 : i64} {
  func.func @lstm_layer_kernel(%arg0: i32, %arg1: memref<16x16xf32, #tpu.memory_space<vmem>>, %arg2: memref<16x128xf32, #tpu.memory_space<vmem>>, %arg3: memref<32x128xf32, #tpu.memory_space<vmem>>, %arg4: memref<1x128xf32, #tpu.memory_space<vmem>>, %arg5: memref<8x2x32xf32, #tpu.memory_space<vmem>>, %arg6: memref<2x32xf32, #tpu.memory_space<vmem>>, %arg7: memref<2x32xf32, #tpu.memory_space<vmem>>) attributes {dimension_semantics = [#tpu.dimension_semantics<arbitrary>], iteration_bounds = array<i64: 1>, scalar_prefetch = 0 : i64, scratch_operands = 2 : i64, tpu.core_type = #tpu.core_type<tc>, window_params = [{transform_indices = @transform_0, window_bounds = array<i64: 16, 16>}, {pipeline_mode = #tpu.pipeline_mode<synchronous>, transform_indices = @transform_1, window_bounds = array<i64: 16, 128>}, {pipeline_mode = #tpu.pipeline_mode<synchronous>, transform_indices = @transform_2, window_bounds = array<i64: 32, 128>}, {pipeline_mode = #tpu.pipeline_mode<synchronous>, transform_indices = @transform_3, window_bounds = array<i64: 1, 128>}, {transform_indices = @transform_4, window_bounds = array<i64: 8, 2, 32>}]} {
    %c0_i32 = arith.constant 0 : i32
    %0 = arith.cmpi eq, %arg0, %c0_i32 : i32
    %1 = arith.extui %0 : i1 to i32
    %c0_i32_0 = arith.constant 0 : i32
    %2 = arith.cmpi ne, %1, %c0_i32_0 : i32
    scf.if %2 {
      %cst_65 = arith.constant 0.000000e+00 : f32
      %262 = vector.broadcast %cst_65 : f32 to vector<2x32xf32>
      %c0_66 = arith.constant 0 : index
      %c0_67 = arith.constant 0 : index
      %263 = vector.load %arg6[%c0_66, %c0_67] : memref<2x32xf32, #tpu.memory_space<vmem>>, vector<2x32xf32>
      tpu.vector_store %arg6[%c0_66, %c0_67], %262 {strides = array<i32>} : memref<2x32xf32, #tpu.memory_space<vmem>>, vector<2x32xf32>,
      %cst_68 = arith.constant 0.000000e+00 : f32
      %264 = vector.broadcast %cst_68 : f32 to vector<2x32xf32>
      %c0_69 = arith.constant 0 : index
      %c0_70 = arith.constant 0 : index
      %265 = vector.load %arg7[%c0_69, %c0_70] : memref<2x32xf32, #tpu.memory_space<vmem>>, vector<2x32xf32>
      tpu.vector_store %arg7[%c0_69, %c0_70], %264 {strides = array<i32>} : memref<2x32xf32, #tpu.memory_space<vmem>>, vector<2x32xf32>,
    } else {
    }
    %c0 = arith.constant 0 : index
    %c0_1 = arith.constant 0 : index
    %3 = vector.load %arg1[%c0, %c0_1] : memref<16x16xf32, #tpu.memory_space<vmem>>, vector<16x16xf32>
    %c0_2 = arith.constant 0 : index
    %c0_3 = arith.constant 0 : index
    %4 = vector.load %arg2[%c0_2, %c0_3] : memref<16x128xf32, #tpu.memory_space<vmem>>, vector<16x128xf32>
    %cst = arith.constant dense<0.000000e+00> : vector<16x128xf32>
    %5 = tpu.matmul %3, %4, %cst {dimension_numbers = #tpu.dot_dimension_numbers<[1], [0], [0], [1], [0, 0, 1, 1], [], []>} : vector<16x16xf32>, vector<16x128xf32>, vector<16x128xf32> -> vector<16x128xf32>
    %c0_4 = arith.constant 0 : index
    %c0_5 = arith.constant 0 : index
    %6 = vector.load %arg4[%c0_4, %c0_5] : memref<1x128xf32, #tpu.memory_space<vmem>>, vector<1x128xf32>
    %7 = vector.broadcast %6 : vector<1x128xf32> to vector<16x128xf32>
    %8 = arith.addf %5, %7 : vector<16x128xf32>
    %c0_6 = arith.constant 0 : index
    %c0_7 = arith.constant 0 : index
    %9 = vector.load %arg3[%c0_6, %c0_7] : memref<32x128xf32, #tpu.memory_space<vmem>>, vector<32x128xf32>
    %c0_8 = arith.constant 0 : index
    %c0_9 = arith.constant 0 : index
    %10 = vector.load %arg6[%c0_8, %c0_9] : memref<2x32xf32, #tpu.memory_space<vmem>>, vector<2x32xf32>
    %c0_10 = arith.constant 0 : index
    %c0_11 = arith.constant 0 : index
    %11 = vector.load %arg7[%c0_10, %c0_11] : memref<2x32xf32, #tpu.memory_space<vmem>>, vector<2x32xf32>
    %12 = vector.extract_strided_slice %8 {offsets = [0, 0], sizes = [2, 128], strides = [1, 1]} : vector<16x128xf32> to vector<2x128xf32>
    %cst_12 = arith.constant dense<0.000000e+00> : vector<2x128xf32>
    %13 = tpu.matmul %10, %9, %cst_12 {dimension_numbers = #tpu.dot_dimension_numbers<[1], [0], [0], [1], [0, 0, 1, 1], [], []>} : vector<2x32xf32>, vector<32x128xf32>, vector<2x128xf32> -> vector<2x128xf32>
    %14 = arith.addf %12, %13 : vector<2x128xf32>
    %15 = vector.extract_strided_slice %14 {offsets = [0, 0], sizes = [2, 32], strides = [1, 1]} : vector<2x128xf32> to vector<2x32xf32>
    %16 = arith.negf %15 : vector<2x32xf32>
    %17 = math.exp %16 : vector<2x32xf32>
    %cst_13 = arith.constant 1.000000e+00 : f32
    %18 = vector.broadcast %cst_13 : f32 to vector<2x32xf32>
    %19 = arith.addf %18, %17 : vector<2x32xf32>
    %20 = arith.divf %18, %19 : vector<2x32xf32>
    %21 = vector.extract_strided_slice %14 {offsets = [0, 32], sizes = [2, 32], strides = [1, 1]} : vector<2x128xf32> to vector<2x32xf32>
    %22 = arith.negf %21 : vector<2x32xf32>
    %23 = math.exp %22 : vector<2x32xf32>
    %cst_14 = arith.constant 1.000000e+00 : f32
    %24 = vector.broadcast %cst_14 : f32 to vector<2x32xf32>
    %25 = arith.addf %24, %23 : vector<2x32xf32>
    %26 = arith.divf %24, %25 : vector<2x32xf32>
    %27 = vector.extract_strided_slice %14 {offsets = [0, 64], sizes = [2, 32], strides = [1, 1]} : vector<2x128xf32> to vector<2x32xf32>
    %28 = math.tanh %27 : vector<2x32xf32>
    %29 = vector.extract_strided_slice %14 {offsets = [0, 96], sizes = [2, 32], strides = [1, 1]} : vector<2x128xf32> to vector<2x32xf32>
    %30 = arith.negf %29 : vector<2x32xf32>
    %31 = math.exp %30 : vector<2x32xf32>
    %cst_15 = arith.constant 1.000000e+00 : f32
    %32 = vector.broadcast %cst_15 : f32 to vector<2x32xf32>
    %33 = arith.addf %32, %31 : vector<2x32xf32>
    %34 = arith.divf %32, %33 : vector<2x32xf32>
    %35 = arith.mulf %26, %11 : vector<2x32xf32>
    %36 = arith.mulf %20, %28 : vector<2x32xf32>
    %37 = arith.addf %35, %36 : vector<2x32xf32>
    %38 = math.tanh %37 : vector<2x32xf32>
    %39 = arith.mulf %34, %38 : vector<2x32xf32>
    %c0_16 = arith.constant 0 : index
    %c0_17 = arith.constant 0 : index
    %c0_18 = arith.constant 0 : index
    %40 = vector.load %arg5[%c0_16, %c0_17, %c0_18] : memref<8x2x32xf32, #tpu.memory_space<vmem>>, vector<1x2x32xf32>
    %41 = vector.shape_cast %40 : vector<1x2x32xf32> to vector<2x32xf32>
    %42 = vector.shape_cast %39 : vector<2x32xf32> to vector<1x2x32xf32>
    tpu.vector_store %arg5[%c0_16, %c0_17, %c0_18], %42 {strides = array<i32>} : memref<8x2x32xf32, #tpu.memory_space<vmem>>, vector<1x2x32xf32>,
    %43 = vector.extract_strided_slice %8 {offsets = [2, 0], sizes = [2, 128], strides = [1, 1]} : vector<16x128xf32> to vector<2x128xf32>
    %cst_19 = arith.constant dense<0.000000e+00> : vector<2x128xf32>
    %44 = tpu.matmul %39, %9, %cst_19 {dimension_numbers = #tpu.dot_dimension_numbers<[1], [0], [0], [1], [0, 0, 1, 1], [], []>} : vector<2x32xf32>, vector<32x128xf32>, vector<2x128xf32> -> vector<2x128xf32>
    %45 = arith.addf %43, %44 : vector<2x128xf32>
    %46 = vector.extract_strided_slice %45 {offsets = [0, 0], sizes = [2, 32], strides = [1, 1]} : vector<2x128xf32> to vector<2x32xf32>
    %47 = arith.negf %46 : vector<2x32xf32>
    %48 = math.exp %47 : vector<2x32xf32>
    %cst_20 = arith.constant 1.000000e+00 : f32
    %49 = vector.broadcast %cst_20 : f32 to vector<2x32xf32>
    %50 = arith.addf %49, %48 : vector<2x32xf32>
    %51 = arith.divf %49, %50 : vector<2x32xf32>
    %52 = vector.extract_strided_slice %45 {offsets = [0, 32], sizes = [2, 32], strides = [1, 1]} : vector<2x128xf32> to vector<2x32xf32>
    %53 = arith.negf %52 : vector<2x32xf32>
    %54 = math.exp %53 : vector<2x32xf32>
    %cst_21 = arith.constant 1.000000e+00 : f32
    %55 = vector.broadcast %cst_21 : f32 to vector<2x32xf32>
    %56 = arith.addf %55, %54 : vector<2x32xf32>
    %57 = arith.divf %55, %56 : vector<2x32xf32>
    %58 = vector.extract_strided_slice %45 {offsets = [0, 64], sizes = [2, 32], strides = [1, 1]} : vector<2x128xf32> to vector<2x32xf32>
    %59 = math.tanh %58 : vector<2x32xf32>
    %60 = vector.extract_strided_slice %45 {offsets = [0, 96], sizes = [2, 32], strides = [1, 1]} : vector<2x128xf32> to vector<2x32xf32>
    %61 = arith.negf %60 : vector<2x32xf32>
    %62 = math.exp %61 : vector<2x32xf32>
    %cst_22 = arith.constant 1.000000e+00 : f32
    %63 = vector.broadcast %cst_22 : f32 to vector<2x32xf32>
    %64 = arith.addf %63, %62 : vector<2x32xf32>
    %65 = arith.divf %63, %64 : vector<2x32xf32>
    %66 = arith.mulf %57, %37 : vector<2x32xf32>
    %67 = arith.mulf %51, %59 : vector<2x32xf32>
    %68 = arith.addf %66, %67 : vector<2x32xf32>
    %69 = math.tanh %68 : vector<2x32xf32>
    %70 = arith.mulf %65, %69 : vector<2x32xf32>
    %c1 = arith.constant 1 : index
    %c0_23 = arith.constant 0 : index
    %c0_24 = arith.constant 0 : index
    %71 = vector.load %arg5[%c1, %c0_23, %c0_24] : memref<8x2x32xf32, #tpu.memory_space<vmem>>, vector<1x2x32xf32>
    %72 = vector.shape_cast %71 : vector<1x2x32xf32> to vector<2x32xf32>
    %73 = vector.shape_cast %70 : vector<2x32xf32> to vector<1x2x32xf32>
    tpu.vector_store %arg5[%c1, %c0_23, %c0_24], %73 {strides = array<i32>} : memref<8x2x32xf32, #tpu.memory_space<vmem>>, vector<1x2x32xf32>,
    %74 = vector.extract_strided_slice %8 {offsets = [4, 0], sizes = [2, 128], strides = [1, 1]} : vector<16x128xf32> to vector<2x128xf32>
    %cst_25 = arith.constant dense<0.000000e+00> : vector<2x128xf32>
    %75 = tpu.matmul %70, %9, %cst_25 {dimension_numbers = #tpu.dot_dimension_numbers<[1], [0], [0], [1], [0, 0, 1, 1], [], []>} : vector<2x32xf32>, vector<32x128xf32>, vector<2x128xf32> -> vector<2x128xf32>
    %76 = arith.addf %74, %75 : vector<2x128xf32>
    %77 = vector.extract_strided_slice %76 {offsets = [0, 0], sizes = [2, 32], strides = [1, 1]} : vector<2x128xf32> to vector<2x32xf32>
    %78 = arith.negf %77 : vector<2x32xf32>
    %79 = math.exp %78 : vector<2x32xf32>
    %cst_26 = arith.constant 1.000000e+00 : f32
    %80 = vector.broadcast %cst_26 : f32 to vector<2x32xf32>
    %81 = arith.addf %80, %79 : vector<2x32xf32>
    %82 = arith.divf %80, %81 : vector<2x32xf32>
    %83 = vector.extract_strided_slice %76 {offsets = [0, 32], sizes = [2, 32], strides = [1, 1]} : vector<2x128xf32> to vector<2x32xf32>
    %84 = arith.negf %83 : vector<2x32xf32>
    %85 = math.exp %84 : vector<2x32xf32>
    %cst_27 = arith.constant 1.000000e+00 : f32
    %86 = vector.broadcast %cst_27 : f32 to vector<2x32xf32>
    %87 = arith.addf %86, %85 : vector<2x32xf32>
    %88 = arith.divf %86, %87 : vector<2x32xf32>
    %89 = vector.extract_strided_slice %76 {offsets = [0, 64], sizes = [2, 32], strides = [1, 1]} : vector<2x128xf32> to vector<2x32xf32>
    %90 = math.tanh %89 : vector<2x32xf32>
    %91 = vector.extract_strided_slice %76 {offsets = [0, 96], sizes = [2, 32], strides = [1, 1]} : vector<2x128xf32> to vector<2x32xf32>
    %92 = arith.negf %91 : vector<2x32xf32>
    %93 = math.exp %92 : vector<2x32xf32>
    %cst_28 = arith.constant 1.000000e+00 : f32
    %94 = vector.broadcast %cst_28 : f32 to vector<2x32xf32>
    %95 = arith.addf %94, %93 : vector<2x32xf32>
    %96 = arith.divf %94, %95 : vector<2x32xf32>
    %97 = arith.mulf %88, %68 : vector<2x32xf32>
    %98 = arith.mulf %82, %90 : vector<2x32xf32>
    %99 = arith.addf %97, %98 : vector<2x32xf32>
    %100 = math.tanh %99 : vector<2x32xf32>
    %101 = arith.mulf %96, %100 : vector<2x32xf32>
    %c2 = arith.constant 2 : index
    %c0_29 = arith.constant 0 : index
    %c0_30 = arith.constant 0 : index
    %102 = vector.load %arg5[%c2, %c0_29, %c0_30] : memref<8x2x32xf32, #tpu.memory_space<vmem>>, vector<1x2x32xf32>
    %103 = vector.shape_cast %102 : vector<1x2x32xf32> to vector<2x32xf32>
    %104 = vector.shape_cast %101 : vector<2x32xf32> to vector<1x2x32xf32>
    tpu.vector_store %arg5[%c2, %c0_29, %c0_30], %104 {strides = array<i32>} : memref<8x2x32xf32, #tpu.memory_space<vmem>>, vector<1x2x32xf32>,
    %105 = vector.extract_strided_slice %8 {offsets = [6, 0], sizes = [2, 128], strides = [1, 1]} : vector<16x128xf32> to vector<2x128xf32>
    %cst_31 = arith.constant dense<0.000000e+00> : vector<2x128xf32>
    %106 = tpu.matmul %101, %9, %cst_31 {dimension_numbers = #tpu.dot_dimension_numbers<[1], [0], [0], [1], [0, 0, 1, 1], [], []>} : vector<2x32xf32>, vector<32x128xf32>, vector<2x128xf32> -> vector<2x128xf32>
    %107 = arith.addf %105, %106 : vector<2x128xf32>
    %108 = vector.extract_strided_slice %107 {offsets = [0, 0], sizes = [2, 32], strides = [1, 1]} : vector<2x128xf32> to vector<2x32xf32>
    %109 = arith.negf %108 : vector<2x32xf32>
    %110 = math.exp %109 : vector<2x32xf32>
    %cst_32 = arith.constant 1.000000e+00 : f32
    %111 = vector.broadcast %cst_32 : f32 to vector<2x32xf32>
    %112 = arith.addf %111, %110 : vector<2x32xf32>
    %113 = arith.divf %111, %112 : vector<2x32xf32>
    %114 = vector.extract_strided_slice %107 {offsets = [0, 32], sizes = [2, 32], strides = [1, 1]} : vector<2x128xf32> to vector<2x32xf32>
    %115 = arith.negf %114 : vector<2x32xf32>
    %116 = math.exp %115 : vector<2x32xf32>
    %cst_33 = arith.constant 1.000000e+00 : f32
    %117 = vector.broadcast %cst_33 : f32 to vector<2x32xf32>
    %118 = arith.addf %117, %116 : vector<2x32xf32>
    %119 = arith.divf %117, %118 : vector<2x32xf32>
    %120 = vector.extract_strided_slice %107 {offsets = [0, 64], sizes = [2, 32], strides = [1, 1]} : vector<2x128xf32> to vector<2x32xf32>
    %121 = math.tanh %120 : vector<2x32xf32>
    %122 = vector.extract_strided_slice %107 {offsets = [0, 96], sizes = [2, 32], strides = [1, 1]} : vector<2x128xf32> to vector<2x32xf32>
    %123 = arith.negf %122 : vector<2x32xf32>
    %124 = math.exp %123 : vector<2x32xf32>
    %cst_34 = arith.constant 1.000000e+00 : f32
    %125 = vector.broadcast %cst_34 : f32 to vector<2x32xf32>
    %126 = arith.addf %125, %124 : vector<2x32xf32>
    %127 = arith.divf %125, %126 : vector<2x32xf32>
    %128 = arith.mulf %119, %99 : vector<2x32xf32>
    %129 = arith.mulf %113, %121 : vector<2x32xf32>
    %130 = arith.addf %128, %129 : vector<2x32xf32>
    %131 = math.tanh %130 : vector<2x32xf32>
    %132 = arith.mulf %127, %131 : vector<2x32xf32>
    %c3 = arith.constant 3 : index
    %c0_35 = arith.constant 0 : index
    %c0_36 = arith.constant 0 : index
    %133 = vector.load %arg5[%c3, %c0_35, %c0_36] : memref<8x2x32xf32, #tpu.memory_space<vmem>>, vector<1x2x32xf32>
    %134 = vector.shape_cast %133 : vector<1x2x32xf32> to vector<2x32xf32>
    %135 = vector.shape_cast %132 : vector<2x32xf32> to vector<1x2x32xf32>
    tpu.vector_store %arg5[%c3, %c0_35, %c0_36], %135 {strides = array<i32>} : memref<8x2x32xf32, #tpu.memory_space<vmem>>, vector<1x2x32xf32>,
    %136 = vector.extract_strided_slice %8 {offsets = [8, 0], sizes = [2, 128], strides = [1, 1]} : vector<16x128xf32> to vector<2x128xf32>
    %cst_37 = arith.constant dense<0.000000e+00> : vector<2x128xf32>
    %137 = tpu.matmul %132, %9, %cst_37 {dimension_numbers = #tpu.dot_dimension_numbers<[1], [0], [0], [1], [0, 0, 1, 1], [], []>} : vector<2x32xf32>, vector<32x128xf32>, vector<2x128xf32> -> vector<2x128xf32>
    %138 = arith.addf %136, %137 : vector<2x128xf32>
    %139 = vector.extract_strided_slice %138 {offsets = [0, 0], sizes = [2, 32], strides = [1, 1]} : vector<2x128xf32> to vector<2x32xf32>
    %140 = arith.negf %139 : vector<2x32xf32>
    %141 = math.exp %140 : vector<2x32xf32>
    %cst_38 = arith.constant 1.000000e+00 : f32
    %142 = vector.broadcast %cst_38 : f32 to vector<2x32xf32>
    %143 = arith.addf %142, %141 : vector<2x32xf32>
    %144 = arith.divf %142, %143 : vector<2x32xf32>
    %145 = vector.extract_strided_slice %138 {offsets = [0, 32], sizes = [2, 32], strides = [1, 1]} : vector<2x128xf32> to vector<2x32xf32>
    %146 = arith.negf %145 : vector<2x32xf32>
    %147 = math.exp %146 : vector<2x32xf32>
    %cst_39 = arith.constant 1.000000e+00 : f32
    %148 = vector.broadcast %cst_39 : f32 to vector<2x32xf32>
    %149 = arith.addf %148, %147 : vector<2x32xf32>
    %150 = arith.divf %148, %149 : vector<2x32xf32>
    %151 = vector.extract_strided_slice %138 {offsets = [0, 64], sizes = [2, 32], strides = [1, 1]} : vector<2x128xf32> to vector<2x32xf32>
    %152 = math.tanh %151 : vector<2x32xf32>
    %153 = vector.extract_strided_slice %138 {offsets = [0, 96], sizes = [2, 32], strides = [1, 1]} : vector<2x128xf32> to vector<2x32xf32>
    %154 = arith.negf %153 : vector<2x32xf32>
    %155 = math.exp %154 : vector<2x32xf32>
    %cst_40 = arith.constant 1.000000e+00 : f32
    %156 = vector.broadcast %cst_40 : f32 to vector<2x32xf32>
    %157 = arith.addf %156, %155 : vector<2x32xf32>
    %158 = arith.divf %156, %157 : vector<2x32xf32>
    %159 = arith.mulf %150, %130 : vector<2x32xf32>
    %160 = arith.mulf %144, %152 : vector<2x32xf32>
    %161 = arith.addf %159, %160 : vector<2x32xf32>
    %162 = math.tanh %161 : vector<2x32xf32>
    %163 = arith.mulf %158, %162 : vector<2x32xf32>
    %c4 = arith.constant 4 : index
    %c0_41 = arith.constant 0 : index
    %c0_42 = arith.constant 0 : index
    %164 = vector.load %arg5[%c4, %c0_41, %c0_42] : memref<8x2x32xf32, #tpu.memory_space<vmem>>, vector<1x2x32xf32>
    %165 = vector.shape_cast %164 : vector<1x2x32xf32> to vector<2x32xf32>
    %166 = vector.shape_cast %163 : vector<2x32xf32> to vector<1x2x32xf32>
    tpu.vector_store %arg5[%c4, %c0_41, %c0_42], %166 {strides = array<i32>} : memref<8x2x32xf32, #tpu.memory_space<vmem>>, vector<1x2x32xf32>,
    %167 = vector.extract_strided_slice %8 {offsets = [10, 0], sizes = [2, 128], strides = [1, 1]} : vector<16x128xf32> to vector<2x128xf32>
    %cst_43 = arith.constant dense<0.000000e+00> : vector<2x128xf32>
    %168 = tpu.matmul %163, %9, %cst_43 {dimension_numbers = #tpu.dot_dimension_numbers<[1], [0], [0], [1], [0, 0, 1, 1], [], []>} : vector<2x32xf32>, vector<32x128xf32>, vector<2x128xf32> -> vector<2x128xf32>
    %169 = arith.addf %167, %168 : vector<2x128xf32>
    %170 = vector.extract_strided_slice %169 {offsets = [0, 0], sizes = [2, 32], strides = [1, 1]} : vector<2x128xf32> to vector<2x32xf32>
    %171 = arith.negf %170 : vector<2x32xf32>
    %172 = math.exp %171 : vector<2x32xf32>
    %cst_44 = arith.constant 1.000000e+00 : f32
    %173 = vector.broadcast %cst_44 : f32 to vector<2x32xf32>
    %174 = arith.addf %173, %172 : vector<2x32xf32>
    %175 = arith.divf %173, %174 : vector<2x32xf32>
    %176 = vector.extract_strided_slice %169 {offsets = [0, 32], sizes = [2, 32], strides = [1, 1]} : vector<2x128xf32> to vector<2x32xf32>
    %177 = arith.negf %176 : vector<2x32xf32>
    %178 = math.exp %177 : vector<2x32xf32>
    %cst_45 = arith.constant 1.000000e+00 : f32
    %179 = vector.broadcast %cst_45 : f32 to vector<2x32xf32>
    %180 = arith.addf %179, %178 : vector<2x32xf32>
    %181 = arith.divf %179, %180 : vector<2x32xf32>
    %182 = vector.extract_strided_slice %169 {offsets = [0, 64], sizes = [2, 32], strides = [1, 1]} : vector<2x128xf32> to vector<2x32xf32>
    %183 = math.tanh %182 : vector<2x32xf32>
    %184 = vector.extract_strided_slice %169 {offsets = [0, 96], sizes = [2, 32], strides = [1, 1]} : vector<2x128xf32> to vector<2x32xf32>
    %185 = arith.negf %184 : vector<2x32xf32>
    %186 = math.exp %185 : vector<2x32xf32>
    %cst_46 = arith.constant 1.000000e+00 : f32
    %187 = vector.broadcast %cst_46 : f32 to vector<2x32xf32>
    %188 = arith.addf %187, %186 : vector<2x32xf32>
    %189 = arith.divf %187, %188 : vector<2x32xf32>
    %190 = arith.mulf %181, %161 : vector<2x32xf32>
    %191 = arith.mulf %175, %183 : vector<2x32xf32>
    %192 = arith.addf %190, %191 : vector<2x32xf32>
    %193 = math.tanh %192 : vector<2x32xf32>
    %194 = arith.mulf %189, %193 : vector<2x32xf32>
    %c5 = arith.constant 5 : index
    %c0_47 = arith.constant 0 : index
    %c0_48 = arith.constant 0 : index
    %195 = vector.load %arg5[%c5, %c0_47, %c0_48] : memref<8x2x32xf32, #tpu.memory_space<vmem>>, vector<1x2x32xf32>
    %196 = vector.shape_cast %195 : vector<1x2x32xf32> to vector<2x32xf32>
    %197 = vector.shape_cast %194 : vector<2x32xf32> to vector<1x2x32xf32>
    tpu.vector_store %arg5[%c5, %c0_47, %c0_48], %197 {strides = array<i32>} : memref<8x2x32xf32, #tpu.memory_space<vmem>>, vector<1x2x32xf32>,
    %198 = vector.extract_strided_slice %8 {offsets = [12, 0], sizes = [2, 128], strides = [1, 1]} : vector<16x128xf32> to vector<2x128xf32>
    %cst_49 = arith.constant dense<0.000000e+00> : vector<2x128xf32>
    %199 = tpu.matmul %194, %9, %cst_49 {dimension_numbers = #tpu.dot_dimension_numbers<[1], [0], [0], [1], [0, 0, 1, 1], [], []>} : vector<2x32xf32>, vector<32x128xf32>, vector<2x128xf32> -> vector<2x128xf32>
    %200 = arith.addf %198, %199 : vector<2x128xf32>
    %201 = vector.extract_strided_slice %200 {offsets = [0, 0], sizes = [2, 32], strides = [1, 1]} : vector<2x128xf32> to vector<2x32xf32>
    %202 = arith.negf %201 : vector<2x32xf32>
    %203 = math.exp %202 : vector<2x32xf32>
    %cst_50 = arith.constant 1.000000e+00 : f32
    %204 = vector.broadcast %cst_50 : f32 to vector<2x32xf32>
    %205 = arith.addf %204, %203 : vector<2x32xf32>
    %206 = arith.divf %204, %205 : vector<2x32xf32>
    %207 = vector.extract_strided_slice %200 {offsets = [0, 32], sizes = [2, 32], strides = [1, 1]} : vector<2x128xf32> to vector<2x32xf32>
    %208 = arith.negf %207 : vector<2x32xf32>
    %209 = math.exp %208 : vector<2x32xf32>
    %cst_51 = arith.constant 1.000000e+00 : f32
    %210 = vector.broadcast %cst_51 : f32 to vector<2x32xf32>
    %211 = arith.addf %210, %209 : vector<2x32xf32>
    %212 = arith.divf %210, %211 : vector<2x32xf32>
    %213 = vector.extract_strided_slice %200 {offsets = [0, 64], sizes = [2, 32], strides = [1, 1]} : vector<2x128xf32> to vector<2x32xf32>
    %214 = math.tanh %213 : vector<2x32xf32>
    %215 = vector.extract_strided_slice %200 {offsets = [0, 96], sizes = [2, 32], strides = [1, 1]} : vector<2x128xf32> to vector<2x32xf32>
    %216 = arith.negf %215 : vector<2x32xf32>
    %217 = math.exp %216 : vector<2x32xf32>
    %cst_52 = arith.constant 1.000000e+00 : f32
    %218 = vector.broadcast %cst_52 : f32 to vector<2x32xf32>
    %219 = arith.addf %218, %217 : vector<2x32xf32>
    %220 = arith.divf %218, %219 : vector<2x32xf32>
    %221 = arith.mulf %212, %192 : vector<2x32xf32>
    %222 = arith.mulf %206, %214 : vector<2x32xf32>
    %223 = arith.addf %221, %222 : vector<2x32xf32>
    %224 = math.tanh %223 : vector<2x32xf32>
    %225 = arith.mulf %220, %224 : vector<2x32xf32>
    %c6 = arith.constant 6 : index
    %c0_53 = arith.constant 0 : index
    %c0_54 = arith.constant 0 : index
    %226 = vector.load %arg5[%c6, %c0_53, %c0_54] : memref<8x2x32xf32, #tpu.memory_space<vmem>>, vector<1x2x32xf32>
    %227 = vector.shape_cast %226 : vector<1x2x32xf32> to vector<2x32xf32>
    %228 = vector.shape_cast %225 : vector<2x32xf32> to vector<1x2x32xf32>
    tpu.vector_store %arg5[%c6, %c0_53, %c0_54], %228 {strides = array<i32>} : memref<8x2x32xf32, #tpu.memory_space<vmem>>, vector<1x2x32xf32>,
    %229 = vector.extract_strided_slice %8 {offsets = [14, 0], sizes = [2, 128], strides = [1, 1]} : vector<16x128xf32> to vector<2x128xf32>
    %cst_55 = arith.constant dense<0.000000e+00> : vector<2x128xf32>
    %230 = tpu.matmul %225, %9, %cst_55 {dimension_numbers = #tpu.dot_dimension_numbers<[1], [0], [0], [1], [0, 0, 1, 1], [], []>} : vector<2x32xf32>, vector<32x128xf32>, vector<2x128xf32> -> vector<2x128xf32>
    %231 = arith.addf %229, %230 : vector<2x128xf32>
    %232 = vector.extract_strided_slice %231 {offsets = [0, 0], sizes = [2, 32], strides = [1, 1]} : vector<2x128xf32> to vector<2x32xf32>
    %233 = arith.negf %232 : vector<2x32xf32>
    %234 = math.exp %233 : vector<2x32xf32>
    %cst_56 = arith.constant 1.000000e+00 : f32
    %235 = vector.broadcast %cst_56 : f32 to vector<2x32xf32>
    %236 = arith.addf %235, %234 : vector<2x32xf32>
    %237 = arith.divf %235, %236 : vector<2x32xf32>
    %238 = vector.extract_strided_slice %231 {offsets = [0, 32], sizes = [2, 32], strides = [1, 1]} : vector<2x128xf32> to vector<2x32xf32>
    %239 = arith.negf %238 : vector<2x32xf32>
    %240 = math.exp %239 : vector<2x32xf32>
    %cst_57 = arith.constant 1.000000e+00 : f32
    %241 = vector.broadcast %cst_57 : f32 to vector<2x32xf32>
    %242 = arith.addf %241, %240 : vector<2x32xf32>
    %243 = arith.divf %241, %242 : vector<2x32xf32>
    %244 = vector.extract_strided_slice %231 {offsets = [0, 64], sizes = [2, 32], strides = [1, 1]} : vector<2x128xf32> to vector<2x32xf32>
    %245 = math.tanh %244 : vector<2x32xf32>
    %246 = vector.extract_strided_slice %231 {offsets = [0, 96], sizes = [2, 32], strides = [1, 1]} : vector<2x128xf32> to vector<2x32xf32>
    %247 = arith.negf %246 : vector<2x32xf32>
    %248 = math.exp %247 : vector<2x32xf32>
    %cst_58 = arith.constant 1.000000e+00 : f32
    %249 = vector.broadcast %cst_58 : f32 to vector<2x32xf32>
    %250 = arith.addf %249, %248 : vector<2x32xf32>
    %251 = arith.divf %249, %250 : vector<2x32xf32>
    %252 = arith.mulf %243, %223 : vector<2x32xf32>
    %253 = arith.mulf %237, %245 : vector<2x32xf32>
    %254 = arith.addf %252, %253 : vector<2x32xf32>
    %255 = math.tanh %254 : vector<2x32xf32>
    %256 = arith.mulf %251, %255 : vector<2x32xf32>
    %c7 = arith.constant 7 : index
    %c0_59 = arith.constant 0 : index
    %c0_60 = arith.constant 0 : index
    %257 = vector.load %arg5[%c7, %c0_59, %c0_60] : memref<8x2x32xf32, #tpu.memory_space<vmem>>, vector<1x2x32xf32>
    %258 = vector.shape_cast %257 : vector<1x2x32xf32> to vector<2x32xf32>
    %259 = vector.shape_cast %256 : vector<2x32xf32> to vector<1x2x32xf32>
    tpu.vector_store %arg5[%c7, %c0_59, %c0_60], %259 {strides = array<i32>} : memref<8x2x32xf32, #tpu.memory_space<vmem>>, vector<1x2x32xf32>,
    %c0_61 = arith.constant 0 : index
    %c0_62 = arith.constant 0 : index
    %260 = vector.load %arg6[%c0_61, %c0_62] : memref<2x32xf32, #tpu.memory_space<vmem>>, vector<2x32xf32>
    tpu.vector_store %arg6[%c0_61, %c0_62], %256 {strides = array<i32>} : memref<2x32xf32, #tpu.memory_space<vmem>>, vector<2x32xf32>,
    %c0_63 = arith.constant 0 : index
    %c0_64 = arith.constant 0 : index
    %261 = vector.load %arg7[%c0_63, %c0_64] : memref<2x32xf32, #tpu.memory_space<vmem>>, vector<2x32xf32>
    tpu.vector_store %arg7[%c0_63, %c0_64], %254 {strides = array<i32>} : memref<2x32xf32, #tpu.memory_space<vmem>>, vector<2x32xf32>,
    return
  }
  func.func @transform_0(%arg0: i32) -> (i32, i32) {
    %c0_i32 = arith.constant 0 : i32
    %c0_i32_0 = arith.constant 0 : i32
    return %arg0, %c0_i32 : i32, i32
  }
  func.func @transform_1(%arg0: i32) -> (i32, i32) {
    %c0_i32 = arith.constant 0 : i32
    %c0_i32_0 = arith.constant 0 : i32
    %c0_i32_1 = arith.constant 0 : i32
    return %c0_i32, %c0_i32_0 : i32, i32
  }
  func.func @transform_2(%arg0: i32) -> (i32, i32) {
    %c0_i32 = arith.constant 0 : i32
    %c0_i32_0 = arith.constant 0 : i32
    %c0_i32_1 = arith.constant 0 : i32
    return %c0_i32, %c0_i32_0 : i32, i32
  }
  func.func @transform_3(%arg0: i32) -> (i32, i32) {
    %c0_i32 = arith.constant 0 : i32
    %c0_i32_0 = arith.constant 0 : i32
    %c0_i32_1 = arith.constant 0 : i32
    return %c0_i32, %c0_i32_0 : i32, i32
  }
  func.func @transform_4(%arg0: i32) -> (i32, i32, i32) {
    %c0_i32 = arith.constant 0 : i32
    %c0_i32_0 = arith.constant 0 : i32
    %c0_i32_1 = arith.constant 0 : i32
    return %arg0, %c0_i32, %c0_i32_0 : i32, i32, i32
  }
}

module attributes {stable_mosaic.version = 11 : i64} {
  func.func @lstm_layer_kernel(%arg0: i32, %arg1: memref<16x32xf32, #tpu.memory_space<vmem>>, %arg2: memref<32x128xf32, #tpu.memory_space<vmem>>, %arg3: memref<32x128xf32, #tpu.memory_space<vmem>>, %arg4: memref<1x128xf32, #tpu.memory_space<vmem>>, %arg5: memref<2x32xf32, #tpu.memory_space<vmem>>, %arg6: memref<2x32xf32, #tpu.memory_space<vmem>>, %arg7: memref<2x32xf32, #tpu.memory_space<vmem>>) attributes {dimension_semantics = [#tpu.dimension_semantics<arbitrary>], iteration_bounds = array<i64: 1>, scalar_prefetch = 0 : i64, scratch_operands = 2 : i64, tpu.core_type = #tpu.core_type<tc>, window_params = [{transform_indices = @transform_0, window_bounds = array<i64: 16, 32>}, {pipeline_mode = #tpu.pipeline_mode<synchronous>, transform_indices = @transform_1, window_bounds = array<i64: 32, 128>}, {pipeline_mode = #tpu.pipeline_mode<synchronous>, transform_indices = @transform_2, window_bounds = array<i64: 32, 128>}, {pipeline_mode = #tpu.pipeline_mode<synchronous>, transform_indices = @transform_3, window_bounds = array<i64: 1, 128>}, {pipeline_mode = #tpu.pipeline_mode<synchronous>, transform_indices = @transform_4, window_bounds = array<i64: 2, 32>}]} {
    %c0_i32 = arith.constant 0 : i32
    %0 = arith.cmpi eq, %arg0, %c0_i32 : i32
    %1 = arith.extui %0 : i1 to i32
    %c0_i32_0 = arith.constant 0 : i32
    %2 = arith.cmpi ne, %1, %c0_i32_0 : i32
    scf.if %2 {
      %cst_50 = arith.constant 0.000000e+00 : f32
      %239 = vector.broadcast %cst_50 : f32 to vector<2x32xf32>
      %c0_51 = arith.constant 0 : index
      %c0_52 = arith.constant 0 : index
      %240 = vector.load %arg6[%c0_51, %c0_52] : memref<2x32xf32, #tpu.memory_space<vmem>>, vector<2x32xf32>
      tpu.vector_store %arg6[%c0_51, %c0_52], %239 {strides = array<i32>} : memref<2x32xf32, #tpu.memory_space<vmem>>, vector<2x32xf32>,
      %cst_53 = arith.constant 0.000000e+00 : f32
      %241 = vector.broadcast %cst_53 : f32 to vector<2x32xf32>
      %c0_54 = arith.constant 0 : index
      %c0_55 = arith.constant 0 : index
      %242 = vector.load %arg7[%c0_54, %c0_55] : memref<2x32xf32, #tpu.memory_space<vmem>>, vector<2x32xf32>
      tpu.vector_store %arg7[%c0_54, %c0_55], %241 {strides = array<i32>} : memref<2x32xf32, #tpu.memory_space<vmem>>, vector<2x32xf32>,
    } else {
    }
    %c0 = arith.constant 0 : index
    %c0_1 = arith.constant 0 : index
    %3 = vector.load %arg1[%c0, %c0_1] : memref<16x32xf32, #tpu.memory_space<vmem>>, vector<16x32xf32>
    %c0_2 = arith.constant 0 : index
    %c0_3 = arith.constant 0 : index
    %4 = vector.load %arg2[%c0_2, %c0_3] : memref<32x128xf32, #tpu.memory_space<vmem>>, vector<32x128xf32>
    %cst = arith.constant dense<0.000000e+00> : vector<16x128xf32>
    %5 = tpu.matmul %3, %4, %cst {dimension_numbers = #tpu.dot_dimension_numbers<[1], [0], [0], [1], [0, 0, 1, 1], [], []>} : vector<16x32xf32>, vector<32x128xf32>, vector<16x128xf32> -> vector<16x128xf32>
    %c0_4 = arith.constant 0 : index
    %c0_5 = arith.constant 0 : index
    %6 = vector.load %arg4[%c0_4, %c0_5] : memref<1x128xf32, #tpu.memory_space<vmem>>, vector<1x128xf32>
    %7 = vector.broadcast %6 : vector<1x128xf32> to vector<16x128xf32>
    %8 = arith.addf %5, %7 : vector<16x128xf32>
    %c0_6 = arith.constant 0 : index
    %c0_7 = arith.constant 0 : index
    %9 = vector.load %arg3[%c0_6, %c0_7] : memref<32x128xf32, #tpu.memory_space<vmem>>, vector<32x128xf32>
    %c0_8 = arith.constant 0 : index
    %c0_9 = arith.constant 0 : index
    %10 = vector.load %arg6[%c0_8, %c0_9] : memref<2x32xf32, #tpu.memory_space<vmem>>, vector<2x32xf32>
    %c0_10 = arith.constant 0 : index
    %c0_11 = arith.constant 0 : index
    %11 = vector.load %arg7[%c0_10, %c0_11] : memref<2x32xf32, #tpu.memory_space<vmem>>, vector<2x32xf32>
    %12 = vector.extract_strided_slice %8 {offsets = [0, 0], sizes = [2, 128], strides = [1, 1]} : vector<16x128xf32> to vector<2x128xf32>
    %cst_12 = arith.constant dense<0.000000e+00> : vector<2x128xf32>
    %13 = tpu.matmul %10, %9, %cst_12 {dimension_numbers = #tpu.dot_dimension_numbers<[1], [0], [0], [1], [0, 0, 1, 1], [], []>} : vector<2x32xf32>, vector<32x128xf32>, vector<2x128xf32> -> vector<2x128xf32>
    %14 = arith.addf %12, %13 : vector<2x128xf32>
    %15 = vector.extract_strided_slice %14 {offsets = [0, 0], sizes = [2, 32], strides = [1, 1]} : vector<2x128xf32> to vector<2x32xf32>
    %16 = arith.negf %15 : vector<2x32xf32>
    %17 = math.exp %16 : vector<2x32xf32>
    %cst_13 = arith.constant 1.000000e+00 : f32
    %18 = vector.broadcast %cst_13 : f32 to vector<2x32xf32>
    %19 = arith.addf %18, %17 : vector<2x32xf32>
    %20 = arith.divf %18, %19 : vector<2x32xf32>
    %21 = vector.extract_strided_slice %14 {offsets = [0, 32], sizes = [2, 32], strides = [1, 1]} : vector<2x128xf32> to vector<2x32xf32>
    %22 = arith.negf %21 : vector<2x32xf32>
    %23 = math.exp %22 : vector<2x32xf32>
    %cst_14 = arith.constant 1.000000e+00 : f32
    %24 = vector.broadcast %cst_14 : f32 to vector<2x32xf32>
    %25 = arith.addf %24, %23 : vector<2x32xf32>
    %26 = arith.divf %24, %25 : vector<2x32xf32>
    %27 = vector.extract_strided_slice %14 {offsets = [0, 64], sizes = [2, 32], strides = [1, 1]} : vector<2x128xf32> to vector<2x32xf32>
    %28 = math.tanh %27 : vector<2x32xf32>
    %29 = vector.extract_strided_slice %14 {offsets = [0, 96], sizes = [2, 32], strides = [1, 1]} : vector<2x128xf32> to vector<2x32xf32>
    %30 = arith.negf %29 : vector<2x32xf32>
    %31 = math.exp %30 : vector<2x32xf32>
    %cst_15 = arith.constant 1.000000e+00 : f32
    %32 = vector.broadcast %cst_15 : f32 to vector<2x32xf32>
    %33 = arith.addf %32, %31 : vector<2x32xf32>
    %34 = arith.divf %32, %33 : vector<2x32xf32>
    %35 = arith.mulf %26, %11 : vector<2x32xf32>
    %36 = arith.mulf %20, %28 : vector<2x32xf32>
    %37 = arith.addf %35, %36 : vector<2x32xf32>
    %38 = math.tanh %37 : vector<2x32xf32>
    %39 = arith.mulf %34, %38 : vector<2x32xf32>
    %40 = vector.extract_strided_slice %8 {offsets = [2, 0], sizes = [2, 128], strides = [1, 1]} : vector<16x128xf32> to vector<2x128xf32>
    %cst_16 = arith.constant dense<0.000000e+00> : vector<2x128xf32>
    %41 = tpu.matmul %39, %9, %cst_16 {dimension_numbers = #tpu.dot_dimension_numbers<[1], [0], [0], [1], [0, 0, 1, 1], [], []>} : vector<2x32xf32>, vector<32x128xf32>, vector<2x128xf32> -> vector<2x128xf32>
    %42 = arith.addf %40, %41 : vector<2x128xf32>
    %43 = vector.extract_strided_slice %42 {offsets = [0, 0], sizes = [2, 32], strides = [1, 1]} : vector<2x128xf32> to vector<2x32xf32>
    %44 = arith.negf %43 : vector<2x32xf32>
    %45 = math.exp %44 : vector<2x32xf32>
    %cst_17 = arith.constant 1.000000e+00 : f32
    %46 = vector.broadcast %cst_17 : f32 to vector<2x32xf32>
    %47 = arith.addf %46, %45 : vector<2x32xf32>
    %48 = arith.divf %46, %47 : vector<2x32xf32>
    %49 = vector.extract_strided_slice %42 {offsets = [0, 32], sizes = [2, 32], strides = [1, 1]} : vector<2x128xf32> to vector<2x32xf32>
    %50 = arith.negf %49 : vector<2x32xf32>
    %51 = math.exp %50 : vector<2x32xf32>
    %cst_18 = arith.constant 1.000000e+00 : f32
    %52 = vector.broadcast %cst_18 : f32 to vector<2x32xf32>
    %53 = arith.addf %52, %51 : vector<2x32xf32>
    %54 = arith.divf %52, %53 : vector<2x32xf32>
    %55 = vector.extract_strided_slice %42 {offsets = [0, 64], sizes = [2, 32], strides = [1, 1]} : vector<2x128xf32> to vector<2x32xf32>
    %56 = math.tanh %55 : vector<2x32xf32>
    %57 = vector.extract_strided_slice %42 {offsets = [0, 96], sizes = [2, 32], strides = [1, 1]} : vector<2x128xf32> to vector<2x32xf32>
    %58 = arith.negf %57 : vector<2x32xf32>
    %59 = math.exp %58 : vector<2x32xf32>
    %cst_19 = arith.constant 1.000000e+00 : f32
    %60 = vector.broadcast %cst_19 : f32 to vector<2x32xf32>
    %61 = arith.addf %60, %59 : vector<2x32xf32>
    %62 = arith.divf %60, %61 : vector<2x32xf32>
    %63 = arith.mulf %54, %37 : vector<2x32xf32>
    %64 = arith.mulf %48, %56 : vector<2x32xf32>
    %65 = arith.addf %63, %64 : vector<2x32xf32>
    %66 = math.tanh %65 : vector<2x32xf32>
    %67 = arith.mulf %62, %66 : vector<2x32xf32>
    %68 = vector.extract_strided_slice %8 {offsets = [4, 0], sizes = [2, 128], strides = [1, 1]} : vector<16x128xf32> to vector<2x128xf32>
    %cst_20 = arith.constant dense<0.000000e+00> : vector<2x128xf32>
    %69 = tpu.matmul %67, %9, %cst_20 {dimension_numbers = #tpu.dot_dimension_numbers<[1], [0], [0], [1], [0, 0, 1, 1], [], []>} : vector<2x32xf32>, vector<32x128xf32>, vector<2x128xf32> -> vector<2x128xf32>
    %70 = arith.addf %68, %69 : vector<2x128xf32>
    %71 = vector.extract_strided_slice %70 {offsets = [0, 0], sizes = [2, 32], strides = [1, 1]} : vector<2x128xf32> to vector<2x32xf32>
    %72 = arith.negf %71 : vector<2x32xf32>
    %73 = math.exp %72 : vector<2x32xf32>
    %cst_21 = arith.constant 1.000000e+00 : f32
    %74 = vector.broadcast %cst_21 : f32 to vector<2x32xf32>
    %75 = arith.addf %74, %73 : vector<2x32xf32>
    %76 = arith.divf %74, %75 : vector<2x32xf32>
    %77 = vector.extract_strided_slice %70 {offsets = [0, 32], sizes = [2, 32], strides = [1, 1]} : vector<2x128xf32> to vector<2x32xf32>
    %78 = arith.negf %77 : vector<2x32xf32>
    %79 = math.exp %78 : vector<2x32xf32>
    %cst_22 = arith.constant 1.000000e+00 : f32
    %80 = vector.broadcast %cst_22 : f32 to vector<2x32xf32>
    %81 = arith.addf %80, %79 : vector<2x32xf32>
    %82 = arith.divf %80, %81 : vector<2x32xf32>
    %83 = vector.extract_strided_slice %70 {offsets = [0, 64], sizes = [2, 32], strides = [1, 1]} : vector<2x128xf32> to vector<2x32xf32>
    %84 = math.tanh %83 : vector<2x32xf32>
    %85 = vector.extract_strided_slice %70 {offsets = [0, 96], sizes = [2, 32], strides = [1, 1]} : vector<2x128xf32> to vector<2x32xf32>
    %86 = arith.negf %85 : vector<2x32xf32>
    %87 = math.exp %86 : vector<2x32xf32>
    %cst_23 = arith.constant 1.000000e+00 : f32
    %88 = vector.broadcast %cst_23 : f32 to vector<2x32xf32>
    %89 = arith.addf %88, %87 : vector<2x32xf32>
    %90 = arith.divf %88, %89 : vector<2x32xf32>
    %91 = arith.mulf %82, %65 : vector<2x32xf32>
    %92 = arith.mulf %76, %84 : vector<2x32xf32>
    %93 = arith.addf %91, %92 : vector<2x32xf32>
    %94 = math.tanh %93 : vector<2x32xf32>
    %95 = arith.mulf %90, %94 : vector<2x32xf32>
    %96 = vector.extract_strided_slice %8 {offsets = [6, 0], sizes = [2, 128], strides = [1, 1]} : vector<16x128xf32> to vector<2x128xf32>
    %cst_24 = arith.constant dense<0.000000e+00> : vector<2x128xf32>
    %97 = tpu.matmul %95, %9, %cst_24 {dimension_numbers = #tpu.dot_dimension_numbers<[1], [0], [0], [1], [0, 0, 1, 1], [], []>} : vector<2x32xf32>, vector<32x128xf32>, vector<2x128xf32> -> vector<2x128xf32>
    %98 = arith.addf %96, %97 : vector<2x128xf32>
    %99 = vector.extract_strided_slice %98 {offsets = [0, 0], sizes = [2, 32], strides = [1, 1]} : vector<2x128xf32> to vector<2x32xf32>
    %100 = arith.negf %99 : vector<2x32xf32>
    %101 = math.exp %100 : vector<2x32xf32>
    %cst_25 = arith.constant 1.000000e+00 : f32
    %102 = vector.broadcast %cst_25 : f32 to vector<2x32xf32>
    %103 = arith.addf %102, %101 : vector<2x32xf32>
    %104 = arith.divf %102, %103 : vector<2x32xf32>
    %105 = vector.extract_strided_slice %98 {offsets = [0, 32], sizes = [2, 32], strides = [1, 1]} : vector<2x128xf32> to vector<2x32xf32>
    %106 = arith.negf %105 : vector<2x32xf32>
    %107 = math.exp %106 : vector<2x32xf32>
    %cst_26 = arith.constant 1.000000e+00 : f32
    %108 = vector.broadcast %cst_26 : f32 to vector<2x32xf32>
    %109 = arith.addf %108, %107 : vector<2x32xf32>
    %110 = arith.divf %108, %109 : vector<2x32xf32>
    %111 = vector.extract_strided_slice %98 {offsets = [0, 64], sizes = [2, 32], strides = [1, 1]} : vector<2x128xf32> to vector<2x32xf32>
    %112 = math.tanh %111 : vector<2x32xf32>
    %113 = vector.extract_strided_slice %98 {offsets = [0, 96], sizes = [2, 32], strides = [1, 1]} : vector<2x128xf32> to vector<2x32xf32>
    %114 = arith.negf %113 : vector<2x32xf32>
    %115 = math.exp %114 : vector<2x32xf32>
    %cst_27 = arith.constant 1.000000e+00 : f32
    %116 = vector.broadcast %cst_27 : f32 to vector<2x32xf32>
    %117 = arith.addf %116, %115 : vector<2x32xf32>
    %118 = arith.divf %116, %117 : vector<2x32xf32>
    %119 = arith.mulf %110, %93 : vector<2x32xf32>
    %120 = arith.mulf %104, %112 : vector<2x32xf32>
    %121 = arith.addf %119, %120 : vector<2x32xf32>
    %122 = math.tanh %121 : vector<2x32xf32>
    %123 = arith.mulf %118, %122 : vector<2x32xf32>
    %124 = vector.extract_strided_slice %8 {offsets = [8, 0], sizes = [2, 128], strides = [1, 1]} : vector<16x128xf32> to vector<2x128xf32>
    %cst_28 = arith.constant dense<0.000000e+00> : vector<2x128xf32>
    %125 = tpu.matmul %123, %9, %cst_28 {dimension_numbers = #tpu.dot_dimension_numbers<[1], [0], [0], [1], [0, 0, 1, 1], [], []>} : vector<2x32xf32>, vector<32x128xf32>, vector<2x128xf32> -> vector<2x128xf32>
    %126 = arith.addf %124, %125 : vector<2x128xf32>
    %127 = vector.extract_strided_slice %126 {offsets = [0, 0], sizes = [2, 32], strides = [1, 1]} : vector<2x128xf32> to vector<2x32xf32>
    %128 = arith.negf %127 : vector<2x32xf32>
    %129 = math.exp %128 : vector<2x32xf32>
    %cst_29 = arith.constant 1.000000e+00 : f32
    %130 = vector.broadcast %cst_29 : f32 to vector<2x32xf32>
    %131 = arith.addf %130, %129 : vector<2x32xf32>
    %132 = arith.divf %130, %131 : vector<2x32xf32>
    %133 = vector.extract_strided_slice %126 {offsets = [0, 32], sizes = [2, 32], strides = [1, 1]} : vector<2x128xf32> to vector<2x32xf32>
    %134 = arith.negf %133 : vector<2x32xf32>
    %135 = math.exp %134 : vector<2x32xf32>
    %cst_30 = arith.constant 1.000000e+00 : f32
    %136 = vector.broadcast %cst_30 : f32 to vector<2x32xf32>
    %137 = arith.addf %136, %135 : vector<2x32xf32>
    %138 = arith.divf %136, %137 : vector<2x32xf32>
    %139 = vector.extract_strided_slice %126 {offsets = [0, 64], sizes = [2, 32], strides = [1, 1]} : vector<2x128xf32> to vector<2x32xf32>
    %140 = math.tanh %139 : vector<2x32xf32>
    %141 = vector.extract_strided_slice %126 {offsets = [0, 96], sizes = [2, 32], strides = [1, 1]} : vector<2x128xf32> to vector<2x32xf32>
    %142 = arith.negf %141 : vector<2x32xf32>
    %143 = math.exp %142 : vector<2x32xf32>
    %cst_31 = arith.constant 1.000000e+00 : f32
    %144 = vector.broadcast %cst_31 : f32 to vector<2x32xf32>
    %145 = arith.addf %144, %143 : vector<2x32xf32>
    %146 = arith.divf %144, %145 : vector<2x32xf32>
    %147 = arith.mulf %138, %121 : vector<2x32xf32>
    %148 = arith.mulf %132, %140 : vector<2x32xf32>
    %149 = arith.addf %147, %148 : vector<2x32xf32>
    %150 = math.tanh %149 : vector<2x32xf32>
    %151 = arith.mulf %146, %150 : vector<2x32xf32>
    %152 = vector.extract_strided_slice %8 {offsets = [10, 0], sizes = [2, 128], strides = [1, 1]} : vector<16x128xf32> to vector<2x128xf32>
    %cst_32 = arith.constant dense<0.000000e+00> : vector<2x128xf32>
    %153 = tpu.matmul %151, %9, %cst_32 {dimension_numbers = #tpu.dot_dimension_numbers<[1], [0], [0], [1], [0, 0, 1, 1], [], []>} : vector<2x32xf32>, vector<32x128xf32>, vector<2x128xf32> -> vector<2x128xf32>
    %154 = arith.addf %152, %153 : vector<2x128xf32>
    %155 = vector.extract_strided_slice %154 {offsets = [0, 0], sizes = [2, 32], strides = [1, 1]} : vector<2x128xf32> to vector<2x32xf32>
    %156 = arith.negf %155 : vector<2x32xf32>
    %157 = math.exp %156 : vector<2x32xf32>
    %cst_33 = arith.constant 1.000000e+00 : f32
    %158 = vector.broadcast %cst_33 : f32 to vector<2x32xf32>
    %159 = arith.addf %158, %157 : vector<2x32xf32>
    %160 = arith.divf %158, %159 : vector<2x32xf32>
    %161 = vector.extract_strided_slice %154 {offsets = [0, 32], sizes = [2, 32], strides = [1, 1]} : vector<2x128xf32> to vector<2x32xf32>
    %162 = arith.negf %161 : vector<2x32xf32>
    %163 = math.exp %162 : vector<2x32xf32>
    %cst_34 = arith.constant 1.000000e+00 : f32
    %164 = vector.broadcast %cst_34 : f32 to vector<2x32xf32>
    %165 = arith.addf %164, %163 : vector<2x32xf32>
    %166 = arith.divf %164, %165 : vector<2x32xf32>
    %167 = vector.extract_strided_slice %154 {offsets = [0, 64], sizes = [2, 32], strides = [1, 1]} : vector<2x128xf32> to vector<2x32xf32>
    %168 = math.tanh %167 : vector<2x32xf32>
    %169 = vector.extract_strided_slice %154 {offsets = [0, 96], sizes = [2, 32], strides = [1, 1]} : vector<2x128xf32> to vector<2x32xf32>
    %170 = arith.negf %169 : vector<2x32xf32>
    %171 = math.exp %170 : vector<2x32xf32>
    %cst_35 = arith.constant 1.000000e+00 : f32
    %172 = vector.broadcast %cst_35 : f32 to vector<2x32xf32>
    %173 = arith.addf %172, %171 : vector<2x32xf32>
    %174 = arith.divf %172, %173 : vector<2x32xf32>
    %175 = arith.mulf %166, %149 : vector<2x32xf32>
    %176 = arith.mulf %160, %168 : vector<2x32xf32>
    %177 = arith.addf %175, %176 : vector<2x32xf32>
    %178 = math.tanh %177 : vector<2x32xf32>
    %179 = arith.mulf %174, %178 : vector<2x32xf32>
    %180 = vector.extract_strided_slice %8 {offsets = [12, 0], sizes = [2, 128], strides = [1, 1]} : vector<16x128xf32> to vector<2x128xf32>
    %cst_36 = arith.constant dense<0.000000e+00> : vector<2x128xf32>
    %181 = tpu.matmul %179, %9, %cst_36 {dimension_numbers = #tpu.dot_dimension_numbers<[1], [0], [0], [1], [0, 0, 1, 1], [], []>} : vector<2x32xf32>, vector<32x128xf32>, vector<2x128xf32> -> vector<2x128xf32>
    %182 = arith.addf %180, %181 : vector<2x128xf32>
    %183 = vector.extract_strided_slice %182 {offsets = [0, 0], sizes = [2, 32], strides = [1, 1]} : vector<2x128xf32> to vector<2x32xf32>
    %184 = arith.negf %183 : vector<2x32xf32>
    %185 = math.exp %184 : vector<2x32xf32>
    %cst_37 = arith.constant 1.000000e+00 : f32
    %186 = vector.broadcast %cst_37 : f32 to vector<2x32xf32>
    %187 = arith.addf %186, %185 : vector<2x32xf32>
    %188 = arith.divf %186, %187 : vector<2x32xf32>
    %189 = vector.extract_strided_slice %182 {offsets = [0, 32], sizes = [2, 32], strides = [1, 1]} : vector<2x128xf32> to vector<2x32xf32>
    %190 = arith.negf %189 : vector<2x32xf32>
    %191 = math.exp %190 : vector<2x32xf32>
    %cst_38 = arith.constant 1.000000e+00 : f32
    %192 = vector.broadcast %cst_38 : f32 to vector<2x32xf32>
    %193 = arith.addf %192, %191 : vector<2x32xf32>
    %194 = arith.divf %192, %193 : vector<2x32xf32>
    %195 = vector.extract_strided_slice %182 {offsets = [0, 64], sizes = [2, 32], strides = [1, 1]} : vector<2x128xf32> to vector<2x32xf32>
    %196 = math.tanh %195 : vector<2x32xf32>
    %197 = vector.extract_strided_slice %182 {offsets = [0, 96], sizes = [2, 32], strides = [1, 1]} : vector<2x128xf32> to vector<2x32xf32>
    %198 = arith.negf %197 : vector<2x32xf32>
    %199 = math.exp %198 : vector<2x32xf32>
    %cst_39 = arith.constant 1.000000e+00 : f32
    %200 = vector.broadcast %cst_39 : f32 to vector<2x32xf32>
    %201 = arith.addf %200, %199 : vector<2x32xf32>
    %202 = arith.divf %200, %201 : vector<2x32xf32>
    %203 = arith.mulf %194, %177 : vector<2x32xf32>
    %204 = arith.mulf %188, %196 : vector<2x32xf32>
    %205 = arith.addf %203, %204 : vector<2x32xf32>
    %206 = math.tanh %205 : vector<2x32xf32>
    %207 = arith.mulf %202, %206 : vector<2x32xf32>
    %208 = vector.extract_strided_slice %8 {offsets = [14, 0], sizes = [2, 128], strides = [1, 1]} : vector<16x128xf32> to vector<2x128xf32>
    %cst_40 = arith.constant dense<0.000000e+00> : vector<2x128xf32>
    %209 = tpu.matmul %207, %9, %cst_40 {dimension_numbers = #tpu.dot_dimension_numbers<[1], [0], [0], [1], [0, 0, 1, 1], [], []>} : vector<2x32xf32>, vector<32x128xf32>, vector<2x128xf32> -> vector<2x128xf32>
    %210 = arith.addf %208, %209 : vector<2x128xf32>
    %211 = vector.extract_strided_slice %210 {offsets = [0, 0], sizes = [2, 32], strides = [1, 1]} : vector<2x128xf32> to vector<2x32xf32>
    %212 = arith.negf %211 : vector<2x32xf32>
    %213 = math.exp %212 : vector<2x32xf32>
    %cst_41 = arith.constant 1.000000e+00 : f32
    %214 = vector.broadcast %cst_41 : f32 to vector<2x32xf32>
    %215 = arith.addf %214, %213 : vector<2x32xf32>
    %216 = arith.divf %214, %215 : vector<2x32xf32>
    %217 = vector.extract_strided_slice %210 {offsets = [0, 32], sizes = [2, 32], strides = [1, 1]} : vector<2x128xf32> to vector<2x32xf32>
    %218 = arith.negf %217 : vector<2x32xf32>
    %219 = math.exp %218 : vector<2x32xf32>
    %cst_42 = arith.constant 1.000000e+00 : f32
    %220 = vector.broadcast %cst_42 : f32 to vector<2x32xf32>
    %221 = arith.addf %220, %219 : vector<2x32xf32>
    %222 = arith.divf %220, %221 : vector<2x32xf32>
    %223 = vector.extract_strided_slice %210 {offsets = [0, 64], sizes = [2, 32], strides = [1, 1]} : vector<2x128xf32> to vector<2x32xf32>
    %224 = math.tanh %223 : vector<2x32xf32>
    %225 = vector.extract_strided_slice %210 {offsets = [0, 96], sizes = [2, 32], strides = [1, 1]} : vector<2x128xf32> to vector<2x32xf32>
    %226 = arith.negf %225 : vector<2x32xf32>
    %227 = math.exp %226 : vector<2x32xf32>
    %cst_43 = arith.constant 1.000000e+00 : f32
    %228 = vector.broadcast %cst_43 : f32 to vector<2x32xf32>
    %229 = arith.addf %228, %227 : vector<2x32xf32>
    %230 = arith.divf %228, %229 : vector<2x32xf32>
    %231 = arith.mulf %222, %205 : vector<2x32xf32>
    %232 = arith.mulf %216, %224 : vector<2x32xf32>
    %233 = arith.addf %231, %232 : vector<2x32xf32>
    %234 = math.tanh %233 : vector<2x32xf32>
    %235 = arith.mulf %230, %234 : vector<2x32xf32>
    %c0_44 = arith.constant 0 : index
    %c0_45 = arith.constant 0 : index
    %236 = vector.load %arg6[%c0_44, %c0_45] : memref<2x32xf32, #tpu.memory_space<vmem>>, vector<2x32xf32>
    tpu.vector_store %arg6[%c0_44, %c0_45], %235 {strides = array<i32>} : memref<2x32xf32, #tpu.memory_space<vmem>>, vector<2x32xf32>,
    %c0_46 = arith.constant 0 : index
    %c0_47 = arith.constant 0 : index
    %237 = vector.load %arg7[%c0_46, %c0_47] : memref<2x32xf32, #tpu.memory_space<vmem>>, vector<2x32xf32>
    tpu.vector_store %arg7[%c0_46, %c0_47], %233 {strides = array<i32>} : memref<2x32xf32, #tpu.memory_space<vmem>>, vector<2x32xf32>,
    %c0_48 = arith.constant 0 : index
    %c0_49 = arith.constant 0 : index
    %238 = vector.load %arg5[%c0_48, %c0_49] : memref<2x32xf32, #tpu.memory_space<vmem>>, vector<2x32xf32>
    tpu.vector_store %arg5[%c0_48, %c0_49], %235 {strides = array<i32>} : memref<2x32xf32, #tpu.memory_space<vmem>>, vector<2x32xf32>,
    return
  }
  func.func @transform_0(%arg0: i32) -> (i32, i32) {
    %c0_i32 = arith.constant 0 : i32
    %c0_i32_0 = arith.constant 0 : i32
    return %arg0, %c0_i32 : i32, i32
  }
  func.func @transform_1(%arg0: i32) -> (i32, i32) {
    %c0_i32 = arith.constant 0 : i32
    %c0_i32_0 = arith.constant 0 : i32
    %c0_i32_1 = arith.constant 0 : i32
    return %c0_i32, %c0_i32_0 : i32, i32
  }
  func.func @transform_2(%arg0: i32) -> (i32, i32) {
    %c0_i32 = arith.constant 0 : i32
    %c0_i32_0 = arith.constant 0 : i32
    %c0_i32_1 = arith.constant 0 : i32
    return %c0_i32, %c0_i32_0 : i32, i32
  }
  func.func @transform_3(%arg0: i32) -> (i32, i32) {
    %c0_i32 = arith.constant 0 : i32
    %c0_i32_0 = arith.constant 0 : i32
    %c0_i32_1 = arith.constant 0 : i32
    return %c0_i32, %c0_i32_0 : i32, i32
  }
  func.func @transform_4(%arg0: i32) -> (i32, i32) {
    %c0_i32 = arith.constant 0 : i32
    %c0_i32_0 = arith.constant 0 : i32
    %c0_i32_1 = arith.constant 0 : i32
    return %c0_i32, %c0_i32_0 : i32, i32
  }
}

</mosaic_0001>

<bundles_post_ra>
// kernel: lstm_forward.2
= control target key start
LH: loop header
LB: loop body
LE: loop exit
PB: predicated region body
PF: predicated region fallthrough
CT: control target
= control target key end

     0   :  { %9 = vsyncpa [#allocation5], 0  ;;  %s1627_s0 = inlined_call_operand.hbm [shape: f32[16,16], index: 0, kind: input, shape index: {}]   ;;  %s1628_s1 = inlined_call_operand.hbm [shape: f32[16,128], index: 1, kind: input, shape index: {}]   ;;  %s1629_s2 = inlined_call_operand.vmem [shape: f32[32,128], index: 2, kind: input, shape index: {}]   ;;  %s1630_s3 = inlined_call_operand.vmem [shape: f32[1,128], index: 3, kind: input, shape index: {}]   ;;  %s1631_s4 = inlined_call_operand.vmem [shape: f32[8,2,32], index: 4, kind: output, shape index: {}]  }
   0x1   :  { %10 = vsyncpa [#allocation7], 0  ;;  %s1389_s15 = smov [#allocation4]   ;;  %s1341_s19 = scalar_lea.hbm %s1627_s0, 256 }
   0x2   :  { %s16_s16 = sshll.u32 %s1389_s15, 4  ;;  %p1342_p0 = scmp.ne.s32.totalorder %s1627_s0, %s1341_s19  ;;  %s17_s16 = int_to_ptr.vmem [resolvable:$true] %s16_s16 }
   0x3   :  { %p1345_p1 = scmp.lt.u32.totalorder %s1341_s19, %s1627_s0 }
   0x5   :  { %p1347_p2 = pnand %p1345_p1, %p1342_p0 }
   0x7   :  { %1350 = shalt.err (!%p1347_p2)
}
   0x8   :  { %s1351_s24 = scalar_lea.vmem %s17_s16, 256  ;;  %p1356_p4 = scmp.lt.s32.totalorder %s17_s16, %s17_s16 }
   0x9   :  { %p1352_p3 = scmp.ne.s32.totalorder %s17_s16, %s1351_s24  ;;  %p1357_p5 = scmp.lt.s32.totalorder %s1351_s24, %s1351_s24 }
   0xb   :  { %p1358_p6 = por %p1357_p5, %p1356_p4 }
   0xd   :  { %p1359_p7 = pnand %p1358_p6, %p1352_p3 }
   0xf   :  { %1362 = shalt.err (!%p1359_p7)
}
  0x10   :  { %s1390_s25 = smov 128   ;;  %s1391_s26 = smov 8  }
  0x11   :  { %22 = dma.hbm_to_vmem [thread:$0]  %s1627_s0, 256, %s17_s16, [#allocation5], %s1390_s25, %s1390_s25, %s1391_s26  }
  0x12   :  { %s1392_s29 = smov [#allocation6]   ;;  %s1363_s7 = scalar_lea.hbm %s1628_s1, 256 }
  0x13   :  { %s28_s30 = sshll.u32 %s1392_s29, 4  ;;  %p1364_p8 = scmp.ne.s32.totalorder %s1628_s1, %s1363_s7  ;;  %s29_s30 = int_to_ptr.vmem [resolvable:$true] %s28_s30 }
  0x14   :  { %p1367_p9 = scmp.lt.u32.totalorder %s1363_s7, %s1628_s1 }
  0x16   :  { %p1369_p10 = pnand %p1367_p9, %p1364_p8 }
  0x18   :  { %1372 = shalt.err (!%p1369_p10)
}
  0x19   :  { %s1373_s12 = scalar_lea.vmem %s29_s30, 256  ;;  %p1378_p12 = scmp.lt.s32.totalorder %s29_s30, %s29_s30 }
  0x1a   :  { %p1374_p11 = scmp.ne.s32.totalorder %s29_s30, %s1373_s12  ;;  %p1379_p13 = scmp.lt.s32.totalorder %s1373_s12, %s1373_s12 }
  0x1c   :  { %p1380_p0 = por %p1379_p13, %p1378_p12 }
  0x1e   :  { %p1381_p1 = pnand %p1380_p0, %p1374_p11 }
  0x20   :  { %1384 = shalt.err (!%p1381_p1)
}
  0x21   :  { %34 = dma.hbm_to_vmem [thread:$0]  %s1628_s1, 256, %s29_s30, [#allocation7], %s1390_s25, %s1390_s25, %s1391_s26  }
  0x22   :  { %1385 = dma.done.wait [#allocation5], 256  }
  0x23   :  { %1386 = vsyncadd [#allocation5], 4294967040 }
  0x24   :  { %1387 = dma.done.wait [#allocation7], 256  }
  0x25   :  { %1388 = vsyncadd [#allocation7], 4294967040  ;;  %v1393_v0 = vmov 0.0|0.0   ;;  %vm1394_vm0 = vmmov 0   ;;  %v1395_v1 = vmov 0.0   ;;  %vm49_vm1 = vcmask 254976  }
  0x26   :  { %1219 = vmatprep.subr.bf16.mxu1 %v1393_v0  ;;  %1135 = vmatprep.mubr.msk.f32.mxu1 %vm1394_vm0, %v1395_v1  ;;  %50 = vst.msk [vmem:[#allocation2] sm:$0x3] %vm49_vm1, %v1395_v1  ;;  %51 = vst.msk [vmem:[#allocation3] sm:$0x3] %vm49_vm1, %v1395_v1  ;;  %vm63_vm2 = vcmask 130048   ;;  %v54_v2 = vld [vmem:[#allocation6] sm:$0xff] }
  0x27   :  { %v55_v3 = vld [vmem:[#allocation6 + $0x8] sm:$0xff]  ;;  %v146_v6 = vld [vmem:[%s1629_s2 + $0x8] sm:$0xff]  ;;  %v147_v9 = vld [vmem:[%s1629_s2 + $0x10] sm:$0xff]  ;;  %vm151_vm3 = vcmask 261120   ;;  %s1396_s22 = smov 64   ;;  %s1397_s23 = smov 32  }
  0x28   :  { %v145_v4 = vld [vmem:[%s1629_s2] sm:$0xff]  ;;  %v1215_v5 = vpack.c.bf16 %v55_v3, %v54_v2  ;;  %v148_v10 = vld [vmem:[%s1629_s2 + $0x18] sm:$0xff]  ;;  %v53_v11 = vld [vmem:[#allocation4 + $0x8] sm:$0xff]  ;;  %vm368_vm4 = vcmask 257026   ;;  %s1398_s27 = smov 96   ;;  %vm594_vm5 = vcmask 261126  }
  0x29   :  { %v52_v7 = vld [vmem:[#allocation4] sm:$0xff]  ;;  %v1461_v8 = vpack.c.bf16 %v146_v6, %v145_v4  ;;  %v1471_v12 = vpack.c.bf16 %v148_v10, %v147_v9  ;;  %v1050_v14 = vld [vmem:[%s1630_s3] ss:$0 sm:$0xff]  ;;  %vm481_vm6 = vcmask 259076  }
  0x2a   :  { %1124 = vmatprep.mubr.msk.f32.mxu0 %vm63_vm2, %v52_v7  ;;  %1216 = vmatprep.subr.bf16.mxu0 %v1215_v5 }
  0x2b   :  { %1221 = vmatpush3.bf16.msra.mxu1 %v1461_v8  ;;  %1218 = vmatpush3.bf16.msra.mxu0 %v1215_v5 }
  0x2c   :  { %1222 = vmatprep.subr.bf16.mxu1 %v1393_v0  ;;  %1225 = vmatprep.subr.bf16.mxu0 %v1393_v0 }
  0x2d   :  { %v149_v13 = vld [vmem:[#allocation2] sm:$0x3]  ;;  %v150_v23 = vld [vmem:[#allocation3] sm:$0x3] }
  0x2e   :  { %1125 = vmatmul.mubr.msk.f32.vlgmr.msra.gmra.mrb[0].mxu0 %vm63_vm2, %v53_v11 }
  0x2f   :  { %1224 = vmatpush3.bf16.msra.mxu1 %v1471_v12  ;;  %1227 = vmatpush3.bf16.msra.mxu0 %v1461_v8 }
  0x30   :  { %1228 = vmatprep.subr.bf16.mxu0 %v1393_v0  ;;  %1146 = vmatprep.mubr.msk.f32.mxu0 %vm1394_vm0, %v1395_v1 }
  0x31   :  { %1231 = vmatprep.subr.bf16.mxu1 %v1393_v0 }
  0x32   :  { %1136 = vmatmul.mubr.msk.f32.vlgmr.msra.gmra.mrb[0].mxu1 %vm151_vm3, %v149_v13 }
  0x33   :  { %1230 = vmatpush3.bf16.msra.mxu0 %v1471_v12  ;;  %1233 = vmatpush3.bf16.msra.mxu1 %v1461_v8 }
  0x34   :  { %1234 = vmatprep.subr.bf16.mxu1 %v1393_v0  ;;  %1157 = vmatprep.mubr.msk.f32.mxu1 %vm1394_vm0, %v1395_v1 }
  0x35   :  { %1237 = vmatprep.subr.bf16.mxu0 %v1393_v0 }
  0x37   :  { %1236 = vmatpush3.bf16.msra.mxu1 %v1471_v12 }
  0x38   :  { %1243 = vmatprep.subr.bf16.mxu1 %v1393_v0 }
 0x101   :  { %v1126_v15 = vpop.f32.mrb[0].mxu0 }
 0x102   :  { %v1494_v16 = vadd.f32 %v1126_v15, %v1050_v14  ;;  %v136_v17 = vpop.f32.mrb[1].mxu0 }
 0x103   :  { %v1496_v18 = vadd.f32 %v1050_v14, %v136_v17 }
 0x105   :  { %v221_v19 = vpop.f32.mrb[0].mxu1 }
 0x106   :  { %v225_v20 = vadd.f32 %v221_v19, %v1496_v18  ;;  %v1137_v21 = vpop.f32.mrb[1].mxu1 }
 0x108   :  { %1277 = vtanh.f32 %v225_v20  ;;  %v1054_v24 = vmul.f32 -1.442695, %v225_v20 }
 0x10a   :  { %1279 = vpow2.f32 %v1054_v24 }
 0x112   :  { %v1278_v22 = vpop.eup %1277 }
 0x113   :  { %239 = vrot.lane.b32.xlu0 %v1278_v22, %s1396_s22 }
 0x114   :  { %v1280_v25 = vpop.eup %1279 }
 0x115   :  { %v229_v26 = vadd.f32 1.0, %v1280_v25 }
 0x117   :  { %234 = vrot.lane.b32.xlu0 %v150_v23, %s1397_s23  ;;  %1281 = vrcp.f32 %v229_v26 }
 0x121   :  { %v1282_v27 = vpop.eup %1281 }
 0x185   :  { %v240_v28 = vpop.permute.xlu0 %239 }
 0x186   :  { %v242_v29 = vmul.f32 %v1282_v27, %v240_v28 }
 0x188   :  { %244 = vrot.lane.b32.xlu1 %v242_v29, %s1397_s23 }
 0x189   :  { %v235_v30 = vpop.permute.xlu0 %234 }
 0x18a   :  { %v237_v31 = vmul.f32 %v1282_v27, %v235_v30 }
 0x1fa   :  { %v245_v32 = vpop.permute.xlu1 %244 }
 0x1fb   :  { %v247_v33 = vadd.f32 %v245_v32, %v237_v31 }
 0x1fd   :  { %1283 = vtanh.f32 %v247_v33  ;;  %v344_v49 = vrot.slane %v247_v33, 6 }
 0x207   :  { %v1284_v34 = vpop.eup %1283 }
 0x208   :  { %250 = vrot.lane.b32.xlu1 %v1284_v34, %s1396_s22 }
 0x27a   :  { %v251_v35 = vpop.permute.xlu1 %250 }
 0x27b   :  { %v253_v36 = vmul.f32 %v1282_v27, %v251_v35 }
 0x27d   :  { %255 = vrot.lane.b32.xlu0 %v253_v36, %s1397_s23 }
 0x2ef   :  { %v256_v37 = vpop.permute.xlu0 %255 }
 0x2f0   :  { %259 = vst.msk [vmem:[%s1631_s4] sm:$0x3] %vm49_vm1, %v256_v37  ;;  %1147 = vmatmul.mubr.msk.f32.vlgmr.msra.gmra.mrb[2].mxu0 %vm151_vm3, %v256_v37 }
 0x2f1   :  { %1239 = vmatpush3.bf16.msra.mxu0 %v1461_v8  ;;  %1168 = vmatprep.mubr.msk.f32.mxu0 %vm1394_vm0, %v1395_v1 }
 0x2f2   :  { %1240 = vmatprep.subr.bf16.mxu0 %v1393_v0 }
 0x2f5   :  { %1242 = vmatpush3.bf16.msra.mxu0 %v1471_v12 }
 0x2f6   :  { %1249 = vmatprep.subr.bf16.mxu0 %v1393_v0 }
 0x3c3   :  { %v328_v38 = vpop.f32.mrb[2].mxu0 }
 0x3c4   :  { %v333_v39 = vrot.slane %v328_v38, 6  ;;  %v1148_v40 = vpop.f32.mrb[3].mxu0 }
 0x3c6   :  { %v335_v41 = vadd.f32 %v333_v39, %v1496_v18 }
 0x3c8   :  { %1285 = vtanh.f32 %v335_v41  ;;  %v1056_v43 = vmul.f32 -1.442695, %v335_v41 }
 0x3ca   :  { %1287 = vpow2.f32 %v1056_v43 }
 0x3d2   :  { %v1286_v42 = vpop.eup %1285 }
 0x3d3   :  { %348 = vrot.lane.b32.xlu1 %v1286_v42, %s1396_s22 }
 0x3d4   :  { %v1288_v44 = vpop.eup %1287 }
 0x3d5   :  { %v339_v45 = vadd.f32 1.0, %v1288_v44 }
 0x3d7   :  { %1289 = vrcp.f32 %v339_v45 }
 0x3e1   :  { %v1290_v46 = vpop.eup %1289 }
 0x3e2   :  { %v346_v50 = vmul.f32 %v1290_v46, %v344_v49 }
 0x445   :  { %v349_v47 = vpop.permute.xlu1 %348 }
 0x446   :  { %v351_v48 = vmul.f32 %v1290_v46, %v349_v47 }
 0x448   :  { %353 = vrot.lane.b32.xlu0 %v351_v48, %s1397_s23 }
 0x4ba   :  { %v354_v51 = vpop.permute.xlu0 %353 }
 0x4bb   :  { %v356_v52 = vadd.f32 %v354_v51, %v346_v50 }
 0x4bd   :  { %1291 = vtanh.f32 %v356_v52  ;;  %v457_v7 = vrot.slane %v356_v52, 6 }
 0x4c7   :  { %v1292_v53 = vpop.eup %1291 }
 0x4c8   :  { %359 = vrot.lane.b32.xlu1 %v1292_v53, %s1396_s22 }
 0x53a   :  { %v360_v54 = vpop.permute.xlu1 %359 }
 0x53b   :  { %v1519_v55 = vmul.f32 %v1290_v46, %v360_v54 }
 0x53d   :  { %v370_v56 = vrot.slane %v1519_v55, 2 }
 0x53f   :  { %371 = vrot.lane.b32.xlu0 %v370_v56, %s1397_s23 }
 0x5b1   :  { %v372_v57 = vpop.permute.xlu0 %371 }
 0x5b2   :  { %1158 = vmatmul.mubr.msk.f32.vlgmr.msra.gmra.mrb[2].mxu1 %vm151_vm3, %v372_v57 }
 0x5b3   :  { %1245 = vmatpush3.bf16.msra.mxu1 %v1461_v8  ;;  %1179 = vmatprep.mubr.msk.f32.mxu1 %vm1394_vm0, %v1395_v1 }
 0x5b4   :  { %1246 = vmatprep.subr.bf16.mxu1 %v1393_v0 }
 0x5b7   :  { %1248 = vmatpush3.bf16.msra.mxu1 %v1471_v12 }
 0x5b8   :  { %1255 = vmatprep.subr.bf16.mxu1 %v1393_v0 }
 0x685   :  { %v441_v58 = vpop.f32.mrb[2].mxu1 }
 0x686   :  { %v446_v59 = vrot.slane %v441_v58, 4  ;;  %v1159_v60 = vpop.f32.mrb[3].mxu1 }
 0x688   :  { %v448_v61 = vadd.f32 %v446_v59, %v1496_v18 }
 0x68a   :  { %1293 = vtanh.f32 %v448_v61  ;;  %v1059_v63 = vmul.f32 -1.442695, %v448_v61 }
 0x68c   :  { %1295 = vpow2.f32 %v1059_v63 }
 0x694   :  { %v1294_v62 = vpop.eup %1293 }
 0x695   :  { %461 = vrot.lane.b32.xlu1 %v1294_v62, %s1396_s22 }
 0x696   :  { %v1296_v2 = vpop.eup %1295 }
 0x697   :  { %v452_v3 = vadd.f32 1.0, %v1296_v2 }
 0x699   :  { %1297 = vrcp.f32 %v452_v3 }
 0x6a3   :  { %v1298_v4 = vpop.eup %1297 }
 0x6a4   :  { %v459_v9 = vmul.f32 %v1298_v4, %v457_v7 }
 0x707   :  { %v462_v5 = vpop.permute.xlu1 %461 }
 0x708   :  { %v464_v6 = vmul.f32 %v1298_v4, %v462_v5 }
 0x70a   :  { %466 = vrot.lane.b32.xlu0 %v464_v6, %s1397_s23 }
 0x77c   :  { %v467_v10 = vpop.permute.xlu0 %466 }
 0x77d   :  { %v469_v11 = vadd.f32 %v467_v10, %v459_v9 }
 0x77f   :  { %1299 = vtanh.f32 %v469_v11  ;;  %v570_v31 = vrot.slane %v469_v11, 6 }
 0x789   :  { %v1300_v13 = vpop.eup %1299 }
 0x78a   :  { %472 = vrot.lane.b32.xlu1 %v1300_v13, %s1396_s22 }
 0x7fc   :  { %v473_v14 = vpop.permute.xlu1 %472 }
 0x7fd   :  { %v1534_v15 = vmul.f32 %v1298_v4, %v473_v14 }
 0x7ff   :  { %v483_v17 = vrot.slane %v1534_v15, 4 }
 0x801   :  { %484 = vrot.lane.b32.xlu0 %v483_v17, %s1397_s23 }
 0x873   :  { %v485_v19 = vpop.permute.xlu0 %484 }
 0x874   :  { %1169 = vmatmul.mubr.msk.f32.vlgmr.msra.gmra.mrb[4].mxu0 %vm151_vm3, %v485_v19 }
 0x875   :  { %1251 = vmatpush3.bf16.msra.mxu0 %v1461_v8  ;;  %1190 = vmatprep.mubr.msk.f32.mxu0 %vm1394_vm0, %v1395_v1 }
 0x876   :  { %1252 = vmatprep.subr.bf16.mxu0 %v1393_v0 }
 0x879   :  { %1254 = vmatpush3.bf16.msra.mxu0 %v1471_v12 }
 0x87a   :  { %1261 = vmatprep.subr.bf16.mxu0 %v1393_v0 }
 0x947   :  { %v554_v20 = vpop.f32.mrb[4].mxu0 }
 0x948   :  { %v559_v21 = vrot.slane %v554_v20, 2  ;;  %v1170_v22 = vpop.f32.mrb[5].mxu0 }
 0x94a   :  { %v561_v23 = vadd.f32 %v559_v21, %v1496_v18 }
 0x94c   :  { %1301 = vtanh.f32 %v561_v23  ;;  %v1062_v25 = vmul.f32 -1.442695, %v561_v23 }
 0x94e   :  { %1303 = vpow2.f32 %v1062_v25 }
 0x956   :  { %v1302_v24 = vpop.eup %1301 }
 0x957   :  { %574 = vrot.lane.b32.xlu1 %v1302_v24, %s1396_s22 }
 0x958   :  { %v1304_v26 = vpop.eup %1303 }
 0x959   :  { %v565_v27 = vadd.f32 1.0, %v1304_v26 }
 0x95b   :  { %1305 = vrcp.f32 %v565_v27 }
 0x965   :  { %v1306_v28 = vpop.eup %1305 }
 0x966   :  { %v572_v32 = vmul.f32 %v1306_v28, %v570_v31 }
 0x9c9   :  { %v575_v29 = vpop.permute.xlu1 %574 }
 0x9ca   :  { %v577_v30 = vmul.f32 %v1306_v28, %v575_v29 }
 0x9cc   :  { %579 = vrot.lane.b32.xlu0 %v577_v30, %s1397_s23 }
 0xa3e   :  { %v580_v33 = vpop.permute.xlu0 %579 }
 0xa3f   :  { %v582_v34 = vadd.f32 %v580_v33, %v572_v32 }
 0xa41   :  { %1307 = vtanh.f32 %v582_v34  ;;  %v680_v49 = vrot.slane %v582_v34, 6 }
 0xa4b   :  { %v1308_v18 = vpop.eup %1307 }
 0xa4c   :  { %585 = vrot.lane.b32.xlu1 %v1308_v18, %s1396_s22 }
 0xabe   :  { %v586_v35 = vpop.permute.xlu1 %585 }
 0xabf   :  { %v1549_v36 = vmul.f32 %v1306_v28, %v586_v35 }
 0xac1   :  { %v596_v37 = vrot.slane %v1549_v36, 6 }
 0xac3   :  { %597 = vrot.lane.b32.xlu0 %v596_v37, %s1397_s23 }
 0xb35   :  { %v598_v38 = vpop.permute.xlu0 %597 }
 0xb36   :  { %1180 = vmatmul.mubr.msk.f32.vlgmr.msra.gmra.mrb[4].mxu1 %vm151_vm3, %v598_v38 }
 0xb37   :  { %1257 = vmatpush3.bf16.msra.mxu1 %v1461_v8  ;;  %1201 = vmatprep.mubr.msk.f32.mxu1 %vm1394_vm0, %v1395_v1 }
 0xb38   :  { %1258 = vmatprep.subr.bf16.mxu1 %v1393_v0 }
 0xb3b   :  { %1260 = vmatpush3.bf16.msra.mxu1 %v1471_v12 }
 0xc09   :  { %v667_v39 = vpop.f32.mrb[4].mxu1 }
 0xc0a   :  { %v671_v40 = vadd.f32 %v667_v39, %v1494_v16  ;;  %v1181_v41 = vpop.f32.mrb[5].mxu1 }
 0xc0c   :  { %1309 = vtanh.f32 %v671_v40  ;;  %v1065_v43 = vmul.f32 -1.442695, %v671_v40 }
 0xc0e   :  { %1311 = vpow2.f32 %v1065_v43 }
 0xc16   :  { %v1310_v42 = vpop.eup %1309 }
 0xc17   :  { %684 = vrot.lane.b32.xlu1 %v1310_v42, %s1396_s22 }
 0xc18   :  { %v1312_v44 = vpop.eup %1311 }
 0xc19   :  { %v675_v45 = vadd.f32 1.0, %v1312_v44 }
 0xc1b   :  { %1313 = vrcp.f32 %v675_v45 }
 0xc25   :  { %v1314_v46 = vpop.eup %1313 }
 0xc26   :  { %v682_v50 = vmul.f32 %v1314_v46, %v680_v49 }
 0xc89   :  { %v685_v47 = vpop.permute.xlu1 %684 }
 0xc8a   :  { %v687_v48 = vmul.f32 %v1314_v46, %v685_v47 }
 0xc8c   :  { %689 = vrot.lane.b32.xlu0 %v687_v48, %s1397_s23 }
 0xcfe   :  { %v690_v51 = vpop.permute.xlu0 %689 }
 0xcff   :  { %v692_v52 = vadd.f32 %v690_v51, %v682_v50 }
 0xd01   :  { %1315 = vtanh.f32 %v692_v52 }
 0xd0b   :  { %v1316_v53 = vpop.eup %1315 }
 0xd0c   :  { %695 = vrot.lane.b32.xlu1 %v1316_v53, %s1396_s22 }
 0xd7e   :  { %v696_v54 = vpop.permute.xlu1 %695 }
 0xd7f   :  { %v698_v56 = vmul.f32 %v1314_v46, %v696_v54 }
 0xd81   :  { %700 = vrot.lane.b32.xlu0 %v698_v56, %s1397_s23 }
 0xdf3   :  { %v701_v57 = vpop.permute.xlu0 %700 }
 0xdf4   :  { %1066 = vst.msk [vmem:[%s1631_s4 + $0x8] sm:$0x3] %vm49_vm1, %v701_v57  ;;  %1191 = vmatmul.mubr.msk.f32.vlgmr.msra.gmra.mrb[6].mxu0 %vm151_vm3, %v701_v57 }
 0xdf5   :  { %1263 = vmatpush3.bf16.msra.mxu0 %v1461_v8  ;;  %1212 = vmatprep.mubr.msk.f32.mxu0 %vm1394_vm0, %v1395_v1 }
 0xdf6   :  { %1264 = vmatprep.subr.bf16.mxu0 %v1393_v0  ;;  %v789_v0 = vrot.slane %v692_v52, 6 }
 0xdf9   :  { %1266 = vmatpush3.bf16.msra.mxu0 %v1471_v12 }
 0xec7   :  { %v773_v58 = vpop.f32.mrb[6].mxu0 }
 0xec8   :  { %v778_v59 = vrot.slane %v773_v58, 6  ;;  %v1192_v60 = vpop.f32.mrb[7].mxu0 }
 0xeca   :  { %v780_v61 = vadd.f32 %v778_v59, %v1494_v16 }
 0xecc   :  { %1317 = vtanh.f32 %v780_v61  ;;  %v1068_v63 = vmul.f32 -1.442695, %v780_v61 }
 0xece   :  { %1319 = vpow2.f32 %v1068_v63 }
 0xed6   :  { %v1318_v62 = vpop.eup %1317 }
 0xed7   :  { %793 = vrot.lane.b32.xlu1 %v1318_v62, %s1396_s22 }
 0xed8   :  { %v1320_v2 = vpop.eup %1319 }
 0xed9   :  { %v784_v8 = vadd.f32 1.0, %v1320_v2 }
 0xedb   :  { %1321 = vrcp.f32 %v784_v8 }
 0xee5   :  { %v1322_v3 = vpop.eup %1321 }
 0xee6   :  { %v791_v12 = vmul.f32 %v1322_v3, %v789_v0 }
 0xf49   :  { %v794_v1 = vpop.permute.xlu1 %793 }
 0xf4a   :  { %v796_v4 = vmul.f32 %v1322_v3, %v794_v1 }
 0xf4c   :  { %798 = vrot.lane.b32.xlu0 %v796_v4, %s1397_s23 }
 0xfbe   :  { %v799_v5 = vpop.permute.xlu0 %798 }
 0xfbf   :  { %v801_v6 = vadd.f32 %v799_v5, %v791_v12 }
 0xfc1   :  { %1323 = vtanh.f32 %v801_v6  ;;  %v901_v28 = vrot.slane %v801_v6, 6 }
 0xfcb   :  { %v1324_v7 = vpop.eup %1323 }
 0xfcc   :  { %804 = vrot.lane.b32.xlu1 %v1324_v7, %s1396_s22 }
0x103e   :  { %v805_v9 = vpop.permute.xlu1 %804 }
0x103f   :  { %v1578_v10 = vmul.f32 %v1322_v3, %v805_v9 }
0x1041   :  { %v814_v11 = vrot.slane %v1578_v10, 2 }
0x1043   :  { %815 = vrot.lane.b32.xlu0 %v814_v11, %s1397_s23 }
0x10b5   :  { %v816_v13 = vpop.permute.xlu0 %815 }
0x10b6   :  { %1202 = vmatmul.mubr.msk.f32.vlgmr.msra.gmra.mrb[6].mxu1 %vm151_vm3, %v816_v13 }
0x1189   :  { %v885_v14 = vpop.f32.mrb[6].mxu1 }
0x118a   :  { %v890_v17 = vrot.slane %v885_v14, 4  ;;  %v1203_v19 = vpop.f32.mrb[7].mxu1 }
0x118c   :  { %v892_v20 = vadd.f32 %v890_v17, %v1494_v16 }
0x118e   :  { %1325 = vtanh.f32 %v892_v20  ;;  %v1071_v22 = vmul.f32 -1.442695, %v892_v20 }
0x1190   :  { %1327 = vpow2.f32 %v1071_v22 }
0x1198   :  { %v1326_v21 = vpop.eup %1325 }
0x1199   :  { %905 = vrot.lane.b32.xlu1 %v1326_v21, %s1396_s22 }
0x119a   :  { %v1328_v23 = vpop.eup %1327 }
0x119b   :  { %v896_v24 = vadd.f32 1.0, %v1328_v23 }
0x119d   :  { %1329 = vrcp.f32 %v896_v24 }
0x11a7   :  { %v1330_v25 = vpop.eup %1329 }
0x11a8   :  { %v903_v29 = vmul.f32 %v1330_v25, %v901_v28 }
0x120b   :  { %v906_v26 = vpop.permute.xlu1 %905 }
0x120c   :  { %v908_v27 = vmul.f32 %v1330_v25, %v906_v26 }
0x120e   :  { %910 = vrot.lane.b32.xlu0 %v908_v27, %s1397_s23 }
0x1280   :  { %v911_v30 = vpop.permute.xlu0 %910 }
0x1281   :  { %v913_v31 = vadd.f32 %v911_v30, %v903_v29 }
0x1283   :  { %1331 = vtanh.f32 %v913_v31 }
0x128d   :  { %v1332_v32 = vpop.eup %1331 }
0x128e   :  { %916 = vrot.lane.b32.xlu1 %v1332_v32, %s1396_s22 }
0x1300   :  { %v917_v33 = vpop.permute.xlu1 %916 }
0x1301   :  { %v919_v34 = vmul.f32 %v1330_v25, %v917_v33 }
0x1303   :  { %v926_v18 = vrot.slane %v919_v34, 4 }
0x1305   :  { %927 = vrot.lane.b32.xlu0 %v926_v18, %s1397_s23 }
0x1377   :  { %v928_v35 = vpop.permute.xlu0 %927 }
0x1378   :  { %1213 = vmatmul.mubr.msk.f32.vlgmr.msra.gmra.mrb[8].mxu0 %vm151_vm3, %v928_v35 }
0x144b   :  { %v997_v37 = vpop.f32.mrb[8].mxu0 }
0x144c   :  { %v1002_v38 = vrot.slane %v997_v37, 2  ;;  %v1214_v39 = vpop.f32.mrb[9].mxu0 }
0x144e   :  { %v1004_v40 = vadd.f32 %v1002_v38, %v1494_v16  ;;  %v1013_v16 = vrot.slane %v913_v31, 6 }
0x1450   :  { %1333 = vtanh.f32 %v1004_v40  ;;  %v1074_v42 = vmul.f32 -1.442695, %v1004_v40 }
0x1452   :  { %1335 = vpow2.f32 %v1074_v42 }
0x145a   :  { %v1334_v41 = vpop.eup %1333 }
0x145b   :  { %1017 = vrot.lane.b32.xlu1 %v1334_v41, %s1396_s22 }
0x145c   :  { %v1336_v43 = vpop.eup %1335 }
0x145d   :  { %v1008_v44 = vadd.f32 1.0, %v1336_v43 }
0x145f   :  { %1337 = vrcp.f32 %v1008_v44 }
0x1469   :  { %v1338_v45 = vpop.eup %1337 }
0x146a   :  { %v1015_v48 = vmul.f32 %v1338_v45, %v1013_v16 }
0x14cd   :  { %v1018_v46 = vpop.permute.xlu1 %1017 }
0x14ce   :  { %v1020_v47 = vmul.f32 %v1338_v45, %v1018_v46 }
0x14d0   :  { %1022 = vrot.lane.b32.xlu0 %v1020_v47, %s1397_s23 }
0x14d4   :  { %364 = vrot.lane.b32.xlu0 %v1519_v55, %s1397_s23 }
0x14d8   :  { %590 = vrot.lane.b32.xlu0 %v1549_v36, %s1397_s23 }
0x14dc   :  { %921 = vrot.lane.b32.xlu0 %v919_v34, %s1397_s23 }
0x1542   :  { %v1023_v49 = vpop.permute.xlu0 %1022 }
0x1543   :  { %v1025_v50 = vadd.f32 %v1023_v49, %v1015_v48 }
0x1545   :  { %1339 = vtanh.f32 %v1025_v50  ;;  %1040 = vrot.lane.b32.xlu0 %v1025_v50, %s1398_s27 }
0x1546   :  { %v365_v51 = vpop.permute.xlu0 %364 }
0x1547   :  { %1057 = vst.msk [vmem:[%s1631_s4] sm:$0xc] %vm368_vm4, %v365_v51 }
0x154a   :  { %v591_v55 = vpop.permute.xlu0 %590 }
0x154b   :  { %1063 = vst.msk [vmem:[%s1631_s4] sm:$0xc0] %vm594_vm5, %v591_v55 }
0x154e   :  { %v922_v36 = vpop.permute.xlu0 %921 }
0x154f   :  { %v1340_v52 = vpop.eup %1339  ;;  %1072 = vst.msk [vmem:[%s1631_s4 + $0x8] sm:$0x30] %vm481_vm6, %v922_v36 }
0x1550   :  { %1028 = vrot.lane.b32.xlu1 %v1340_v52, %s1396_s22 }
0x1554   :  { %477 = vrot.lane.b32.xlu1 %v1534_v15, %s1397_s23 }
0x1558   :  { %809 = vrot.lane.b32.xlu1 %v1578_v10, %s1397_s23 }
0x15b7   :  { %v1041_v53 = vpop.permute.xlu0 %1040 }
0x15b8   :  { %1043 = vst.msk [vmem:[#allocation3 - $0x6] sm:$0xc0] %vm594_vm5, %v1041_v53 }
0x15c2   :  { %v1029_v54 = vpop.permute.xlu1 %1028 }
0x15c3   :  { %v1031_v56 = vmul.f32 %v1338_v45, %v1029_v54 }
0x15c5   :  { %1033 = vrot.lane.b32.xlu1 %v1031_v56, %s1397_s23 }
0x15c6   :  { %v478_v57 = vpop.permute.xlu1 %477 }
0x15c7   :  { %1060 = vst.msk [vmem:[%s1631_s4] sm:$0x30] %vm481_vm6, %v478_v57 }
0x15ca   :  { %v810_v58 = vpop.permute.xlu1 %809 }
0x15cb   :  { %1069 = vst.msk [vmem:[%s1631_s4 + $0x8] sm:$0xc] %vm368_vm4, %v810_v58 }
0x1637   :  { %v1034_v15 = vpop.permute.xlu1 %1033 }
0x1638   :  { %1075 = vst.msk [vmem:[%s1631_s4 + $0x8] sm:$0xc0] %vm594_vm5, %v1034_v15  ;;  %1038 = vst.msk [vmem:[#allocation2 - $0x6] sm:$0xc0] %vm594_vm5, %v1034_v15 }
0x1639   :  { %1048 = vsyncpa [#allocation5], 1 }
0x163a   :  { %1049 = vsyncpa [#allocation7], 1 }

// kernel: lstm_forward.3
= control target key start
LH: loop header
LB: loop body
LE: loop exit
PB: predicated region body
PF: predicated region fallthrough
CT: control target
= control target key end

     0   :  { %vm38_vm0 = vcmask 261120   ;;  %v1313_v4 = vmov 0.0|0.0   ;;  %vm22_vm1 = vcmask 254976   ;;  %vm1314_vm2 = vmmov 0   ;;  %s1499_s0 = inlined_call_operand.vmem [shape: f32[16,32], index: 0, kind: input, shape index: {}]   ;;  %s1500_s1 = inlined_call_operand.vmem [shape: f32[32,128], index: 1, kind: input, shape index: {}]   ;;  %s1501_s2 = inlined_call_operand.vmem [shape: f32[32,128], index: 2, kind: input, shape index: {}]   ;;  %s1502_s3 = inlined_call_operand.vmem [shape: f32[1,128], index: 3, kind: input, shape index: {}]   ;;  %s1503_s4 = inlined_call_operand.hbm [shape: f32[2,32], index: 4, kind: output, shape index: {}]  }
   0x1   :  { %v27_v0 = vld [vmem:[%s1500_s1] sm:$0xff]  ;;  %v28_v1 = vld [vmem:[%s1500_s1 + $0x8] sm:$0xff]  ;;  %1170 = vmatprep.subr.bf16.mxu1 %v1313_v4  ;;  %v29_v6 = vld [vmem:[%s1500_s1 + $0x10] sm:$0xff]  ;;  %v1315_v13 = vmov 0.0  }
   0x2   :  { %v120_v2 = vld [vmem:[%s1501_s2] sm:$0xff]  ;;  %v1162_v3 = vpack.c.bf16 %v28_v1, %v27_v0  ;;  %v121_v5 = vld [vmem:[%s1501_s2 + $0x8] sm:$0xff]  ;;  %v30_v7 = vld [vmem:[%s1500_s1 + $0x18] sm:$0xff]  ;;  %1082 = vmatprep.mubr.msk.f32.mxu1 %vm1314_vm2, %v1315_v13  ;;  %23 = vst.msk [vmem:[#allocation2] sm:$0x3] %vm22_vm1, %v1315_v13 }
   0x3   :  { %v1364_v8 = vpack.c.bf16 %v121_v5, %v120_v2  ;;  %v1166_v9 = vpack.c.bf16 %v30_v7, %v29_v6  ;;  %v25_v10 = vld [vmem:[%s1499_s0] sm:$0xff]  ;;  %v122_v11 = vld [vmem:[%s1501_s2 + $0x10] sm:$0xff]  ;;  %v123_v12 = vld [vmem:[%s1501_s2 + $0x18] sm:$0xff]  ;;  %24 = vst.msk [vmem:[#allocation3] sm:$0x3] %vm22_vm1, %v1315_v13 }
   0x4   :  { %1163 = vmatprep.subr.bf16.mxu0 %v1162_v3  ;;  %1071 = vmatprep.mubr.msk.f32.mxu0 %vm38_vm0, %v25_v10 }
   0x5   :  { %9 = vsyncpa [#allocation5], 0  ;;  %1165 = vmatpush3.bf16.msra.mxu0 %v1162_v3  ;;  %1172 = vmatpush3.bf16.msra.mxu1 %v1364_v8  ;;  %v1381_v14 = vpack.c.bf16 %v123_v12, %v122_v11  ;;  %v26_v15 = vld [vmem:[%s1499_s0 + $0x8] sm:$0xff]  ;;  %v998_v17 = vld [vmem:[%s1502_s3] ss:$0 sm:$0xff]  ;;  %s1316_s8 = smov 64  }
   0x6   :  { %1167 = vmatprep.subr.bf16.mxu0 %v1166_v9  ;;  %1173 = vmatprep.subr.bf16.mxu1 %v1313_v4  ;;  %s1317_s9 = smov 32   ;;  %s1318_s3 = smov 96   ;;  %vm976_vm3 = vcmask 261126  }
   0x7   :  { %s1319_s10 = smov [#allocation4]  }
   0x8   :  { %s990_s11 = sshll.u32 %s1319_s10, 4  ;;  %s991_s11 = int_to_ptr.vmem [resolvable:$true] %s990_s11 }
   0x9   :  { %1169 = vmatpush3.bf16.msra.mxu0 %v1166_v9  ;;  %1175 = vmatpush3.bf16.msra.mxu1 %v1381_v14  ;;  %v124_v16 = vld [vmem:[#allocation2] sm:$0x3]  ;;  %s1289_s12 = scalar_lea.vmem %s991_s11, 32  ;;  %p1294_p1 = scmp.lt.s32.totalorder %s991_s11, %s991_s11 }
   0xa   :  { %1176 = vmatprep.subr.bf16.mxu0 %v1313_v4  ;;  %1182 = vmatprep.subr.bf16.mxu1 %v1313_v4  ;;  %v125_v26 = vld [vmem:[#allocation3] sm:$0x3]  ;;  %p1290_p0 = scmp.ne.s32.totalorder %s991_s11, %s1289_s12  ;;  %p1295_p2 = scmp.lt.s32.totalorder %s1289_s12, %s1289_s12 }
   0xc   :  { %1072 = vmatmul.mubr.msk.f32.vlgmr.msra.gmra.mrb[0].mxu0 %vm38_vm0, %v26_v15  ;;  %1083 = vmatmul.mubr.msk.f32.vlgmr.msra.gmra.mrb[0].mxu1 %vm38_vm0, %v124_v16  ;;  %p1296_p3 = por %p1295_p2, %p1294_p1 }
   0xd   :  { %1178 = vmatpush3.bf16.msra.mxu0 %v1364_v8  ;;  %1093 = vmatprep.mubr.msk.f32.mxu0 %vm1314_vm2, %v1315_v13 }
   0xe   :  { %1179 = vmatprep.subr.bf16.mxu0 %v1313_v4  ;;  %1184 = vmatpush3.bf16.msra.mxu1 %v1364_v8  ;;  %p1297_p4 = pnand %p1296_p3, %p1290_p0 }
   0xf   :  { %1185 = vmatprep.subr.bf16.mxu1 %v1313_v4  ;;  %1104 = vmatprep.mubr.msk.f32.mxu1 %vm1314_vm2, %v1315_v13 }
  0x11   :  { %1181 = vmatpush3.bf16.msra.mxu0 %v1381_v14 }
  0x12   :  { %1187 = vmatpush3.bf16.msra.mxu1 %v1381_v14  ;;  %1188 = vmatprep.subr.bf16.mxu0 %v1313_v4 }
  0x13   :  { %1194 = vmatprep.subr.bf16.mxu1 %v1313_v4 }
  0xdf   :  { %v1073_v18 = vpop.f32.mrb[0].mxu0  ;;  %v195_v19 = vpop.f32.mrb[0].mxu1 }
  0xe0   :  { %v1407_v20 = vadd.f32 %v1073_v18, %v998_v17  ;;  %v111_v21 = vpop.f32.mrb[1].mxu0  ;;  %v1084_v22 = vpop.f32.mrb[1].mxu1 }
  0xe1   :  { %v1409_v23 = vadd.f32 %v998_v17, %v111_v21 }
  0xe3   :  { %v199_v24 = vadd.f32 %v195_v19, %v1409_v23 }
  0xe5   :  { %1225 = vtanh.f32 %v199_v24  ;;  %v1002_v27 = vmul.f32 -1.442695, %v199_v24 }
  0xe7   :  { %1227 = vpow2.f32 %v1002_v27 }
  0xef   :  { %v1226_v25 = vpop.eup %1225 }
  0xf0   :  { %213 = vrot.lane.b32.xlu0 %v1226_v25, %s1316_s8 }
  0xf1   :  { %v1228_v28 = vpop.eup %1227 }
  0xf2   :  { %v203_v29 = vadd.f32 1.0, %v1228_v28 }
  0xf4   :  { %208 = vrot.lane.b32.xlu0 %v125_v26, %s1317_s9  ;;  %1229 = vrcp.f32 %v203_v29 }
  0xfe   :  { %v1230_v30 = vpop.eup %1229 }
 0x162   :  { %v214_v31 = vpop.permute.xlu0 %213 }
 0x163   :  { %v216_v32 = vmul.f32 %v1230_v30, %v214_v31 }
 0x165   :  { %218 = vrot.lane.b32.xlu1 %v216_v32, %s1317_s9 }
 0x166   :  { %v209_v33 = vpop.permute.xlu0 %208 }
 0x167   :  { %v211_v34 = vmul.f32 %v1230_v30, %v209_v33 }
 0x1d7   :  { %v219_v35 = vpop.permute.xlu1 %218 }
 0x1d8   :  { %v221_v36 = vadd.f32 %v219_v35, %v211_v34 }
 0x1da   :  { %1231 = vtanh.f32 %v221_v36  ;;  %v315_v52 = vrot.slane %v221_v36, 6 }
 0x1e4   :  { %v1232_v37 = vpop.eup %1231 }
 0x1e5   :  { %224 = vrot.lane.b32.xlu1 %v1232_v37, %s1316_s8 }
 0x257   :  { %v225_v38 = vpop.permute.xlu1 %224 }
 0x258   :  { %v227_v39 = vmul.f32 %v1230_v30, %v225_v38 }
 0x25a   :  { %229 = vrot.lane.b32.xlu0 %v227_v39, %s1317_s9 }
 0x2cc   :  { %v230_v40 = vpop.permute.xlu0 %229 }
 0x2cd   :  { %1094 = vmatmul.mubr.msk.f32.vlgmr.msra.gmra.mrb[2].mxu0 %vm38_vm0, %v230_v40 }
 0x2ce   :  { %1190 = vmatpush3.bf16.msra.mxu0 %v1364_v8  ;;  %1115 = vmatprep.mubr.msk.f32.mxu0 %vm1314_vm2, %v1315_v13 }
 0x2cf   :  { %1191 = vmatprep.subr.bf16.mxu0 %v1313_v4 }
 0x2d2   :  { %1193 = vmatpush3.bf16.msra.mxu0 %v1381_v14 }
 0x2d3   :  { %1200 = vmatprep.subr.bf16.mxu0 %v1313_v4 }
 0x3a0   :  { %v299_v41 = vpop.f32.mrb[2].mxu0 }
 0x3a1   :  { %v304_v42 = vrot.slane %v299_v41, 6  ;;  %v1095_v43 = vpop.f32.mrb[3].mxu0 }
 0x3a3   :  { %v306_v44 = vadd.f32 %v304_v42, %v1409_v23 }
 0x3a5   :  { %1233 = vtanh.f32 %v306_v44  ;;  %v1004_v46 = vmul.f32 -1.442695, %v306_v44 }
 0x3a7   :  { %1235 = vpow2.f32 %v1004_v46 }
 0x3af   :  { %v1234_v45 = vpop.eup %1233 }
 0x3b0   :  { %319 = vrot.lane.b32.xlu1 %v1234_v45, %s1316_s8 }
 0x3b1   :  { %v1236_v47 = vpop.eup %1235 }
 0x3b2   :  { %v310_v48 = vadd.f32 1.0, %v1236_v47 }
 0x3b4   :  { %1237 = vrcp.f32 %v310_v48 }
 0x3be   :  { %v1238_v49 = vpop.eup %1237 }
 0x3bf   :  { %v317_v53 = vmul.f32 %v1238_v49, %v315_v52 }
 0x422   :  { %v320_v50 = vpop.permute.xlu1 %319 }
 0x423   :  { %v322_v51 = vmul.f32 %v1238_v49, %v320_v50 }
 0x425   :  { %324 = vrot.lane.b32.xlu0 %v322_v51, %s1317_s9 }
 0x497   :  { %v325_v54 = vpop.permute.xlu0 %324 }
 0x498   :  { %v327_v55 = vadd.f32 %v325_v54, %v317_v53 }
 0x49a   :  { %1239 = vtanh.f32 %v327_v55  ;;  %v422_v10 = vrot.slane %v327_v55, 6 }
 0x4a4   :  { %v1240_v56 = vpop.eup %1239 }
 0x4a5   :  { %330 = vrot.lane.b32.xlu1 %v1240_v56, %s1316_s8 }
 0x517   :  { %v331_v57 = vpop.permute.xlu1 %330 }
 0x518   :  { %v333_v58 = vmul.f32 %v1238_v49, %v331_v57 }
 0x51a   :  { %v335_v59 = vrot.slane %v333_v58, 2 }
 0x51c   :  { %336 = vrot.lane.b32.xlu0 %v335_v59, %s1317_s9 }
 0x58e   :  { %v337_v60 = vpop.permute.xlu0 %336 }
 0x58f   :  { %1105 = vmatmul.mubr.msk.f32.vlgmr.msra.gmra.mrb[2].mxu1 %vm38_vm0, %v337_v60 }
 0x590   :  { %1196 = vmatpush3.bf16.msra.mxu1 %v1364_v8  ;;  %1126 = vmatprep.mubr.msk.f32.mxu1 %vm1314_vm2, %v1315_v13 }
 0x591   :  { %1197 = vmatprep.subr.bf16.mxu1 %v1313_v4 }
 0x594   :  { %1199 = vmatpush3.bf16.msra.mxu1 %v1381_v14 }
 0x595   :  { %1206 = vmatprep.subr.bf16.mxu1 %v1313_v4 }
 0x662   :  { %v406_v61 = vpop.f32.mrb[2].mxu1 }
 0x663   :  { %v411_v62 = vrot.slane %v406_v61, 4  ;;  %v1106_v63 = vpop.f32.mrb[3].mxu1 }
 0x665   :  { %v413_v0 = vadd.f32 %v411_v62, %v1409_v23 }
 0x667   :  { %1241 = vtanh.f32 %v413_v0  ;;  %v1006_v2 = vmul.f32 -1.442695, %v413_v0 }
 0x669   :  { %1243 = vpow2.f32 %v1006_v2 }
 0x671   :  { %v1242_v1 = vpop.eup %1241 }
 0x672   :  { %426 = vrot.lane.b32.xlu1 %v1242_v1, %s1316_s8 }
 0x673   :  { %v1244_v3 = vpop.eup %1243 }
 0x674   :  { %v417_v5 = vadd.f32 1.0, %v1244_v3 }
 0x676   :  { %1245 = vrcp.f32 %v417_v5 }
 0x680   :  { %v1246_v6 = vpop.eup %1245 }
 0x681   :  { %v424_v11 = vmul.f32 %v1246_v6, %v422_v10 }
 0x6e4   :  { %v427_v7 = vpop.permute.xlu1 %426 }
 0x6e5   :  { %v429_v9 = vmul.f32 %v1246_v6, %v427_v7 }
 0x6e7   :  { %431 = vrot.lane.b32.xlu0 %v429_v9, %s1317_s9 }
 0x759   :  { %v432_v12 = vpop.permute.xlu0 %431 }
 0x75a   :  { %v434_v15 = vadd.f32 %v432_v12, %v424_v11 }
 0x75c   :  { %1247 = vtanh.f32 %v434_v15  ;;  %v529_v34 = vrot.slane %v434_v15, 6 }
 0x766   :  { %v1248_v16 = vpop.eup %1247 }
 0x767   :  { %437 = vrot.lane.b32.xlu1 %v1248_v16, %s1316_s8 }
 0x7d9   :  { %v438_v17 = vpop.permute.xlu1 %437 }
 0x7da   :  { %v440_v18 = vmul.f32 %v1246_v6, %v438_v17 }
 0x7dc   :  { %v442_v19 = vrot.slane %v440_v18, 4 }
 0x7de   :  { %443 = vrot.lane.b32.xlu0 %v442_v19, %s1317_s9 }
 0x850   :  { %v444_v21 = vpop.permute.xlu0 %443 }
 0x851   :  { %1116 = vmatmul.mubr.msk.f32.vlgmr.msra.gmra.mrb[4].mxu0 %vm38_vm0, %v444_v21 }
 0x852   :  { %1202 = vmatpush3.bf16.msra.mxu0 %v1364_v8  ;;  %1137 = vmatprep.mubr.msk.f32.mxu0 %vm1314_vm2, %v1315_v13 }
 0x853   :  { %1203 = vmatprep.subr.bf16.mxu0 %v1313_v4 }
 0x856   :  { %1205 = vmatpush3.bf16.msra.mxu0 %v1381_v14 }
 0x857   :  { %1212 = vmatprep.subr.bf16.mxu0 %v1313_v4 }
 0x924   :  { %v513_v22 = vpop.f32.mrb[4].mxu0 }
 0x925   :  { %v518_v24 = vrot.slane %v513_v22, 2  ;;  %v1117_v25 = vpop.f32.mrb[5].mxu0 }
 0x927   :  { %v520_v26 = vadd.f32 %v518_v24, %v1409_v23 }
 0x929   :  { %1249 = vtanh.f32 %v520_v26  ;;  %v1008_v28 = vmul.f32 -1.442695, %v520_v26 }
 0x92b   :  { %1251 = vpow2.f32 %v1008_v28 }
 0x933   :  { %v1250_v27 = vpop.eup %1249 }
 0x934   :  { %533 = vrot.lane.b32.xlu1 %v1250_v27, %s1316_s8 }
 0x935   :  { %v1252_v29 = vpop.eup %1251 }
 0x936   :  { %v524_v30 = vadd.f32 1.0, %v1252_v29 }
 0x938   :  { %1253 = vrcp.f32 %v524_v30 }
 0x942   :  { %v1254_v31 = vpop.eup %1253 }
 0x943   :  { %v531_v35 = vmul.f32 %v1254_v31, %v529_v34 }
 0x9a6   :  { %v534_v32 = vpop.permute.xlu1 %533 }
 0x9a7   :  { %v536_v33 = vmul.f32 %v1254_v31, %v534_v32 }
 0x9a9   :  { %538 = vrot.lane.b32.xlu0 %v536_v33, %s1317_s9 }
 0xa1b   :  { %v539_v36 = vpop.permute.xlu0 %538 }
 0xa1c   :  { %v541_v37 = vadd.f32 %v539_v36, %v531_v35 }
 0xa1e   :  { %1255 = vtanh.f32 %v541_v37  ;;  %v633_v52 = vrot.slane %v541_v37, 6 }
 0xa28   :  { %v1256_v23 = vpop.eup %1255 }
 0xa29   :  { %544 = vrot.lane.b32.xlu1 %v1256_v23, %s1316_s8 }
 0xa9b   :  { %v545_v38 = vpop.permute.xlu1 %544 }
 0xa9c   :  { %v547_v39 = vmul.f32 %v1254_v31, %v545_v38 }
 0xa9e   :  { %v549_v40 = vrot.slane %v547_v39, 6 }
 0xaa0   :  { %550 = vrot.lane.b32.xlu0 %v549_v40, %s1317_s9 }
 0xb12   :  { %v551_v41 = vpop.permute.xlu0 %550 }
 0xb13   :  { %1127 = vmatmul.mubr.msk.f32.vlgmr.msra.gmra.mrb[4].mxu1 %vm38_vm0, %v551_v41 }
 0xb14   :  { %1208 = vmatpush3.bf16.msra.mxu1 %v1364_v8  ;;  %1148 = vmatprep.mubr.msk.f32.mxu1 %vm1314_vm2, %v1315_v13 }
 0xb15   :  { %1209 = vmatprep.subr.bf16.mxu1 %v1313_v4 }
 0xb18   :  { %1211 = vmatpush3.bf16.msra.mxu1 %v1381_v14 }
 0xbe6   :  { %v620_v42 = vpop.f32.mrb[4].mxu1 }
 0xbe7   :  { %v624_v43 = vadd.f32 %v620_v42, %v1407_v20  ;;  %v1128_v44 = vpop.f32.mrb[5].mxu1 }
 0xbe9   :  { %1257 = vtanh.f32 %v624_v43  ;;  %v1010_v46 = vmul.f32 -1.442695, %v624_v43 }
 0xbeb   :  { %1259 = vpow2.f32 %v1010_v46 }
 0xbf3   :  { %v1258_v45 = vpop.eup %1257 }
 0xbf4   :  { %637 = vrot.lane.b32.xlu1 %v1258_v45, %s1316_s8 }
 0xbf5   :  { %v1260_v47 = vpop.eup %1259 }
 0xbf6   :  { %v628_v48 = vadd.f32 1.0, %v1260_v47 }
 0xbf8   :  { %1261 = vrcp.f32 %v628_v48 }
 0xc02   :  { %v1262_v49 = vpop.eup %1261 }
 0xc03   :  { %v635_v53 = vmul.f32 %v1262_v49, %v633_v52 }
 0xc66   :  { %v638_v50 = vpop.permute.xlu1 %637 }
 0xc67   :  { %v640_v51 = vmul.f32 %v1262_v49, %v638_v50 }
 0xc69   :  { %642 = vrot.lane.b32.xlu0 %v640_v51, %s1317_s9 }
 0xcdb   :  { %v643_v54 = vpop.permute.xlu0 %642 }
 0xcdc   :  { %v645_v55 = vadd.f32 %v643_v54, %v635_v53 }
 0xcde   :  { %1263 = vtanh.f32 %v645_v55 }
 0xce8   :  { %v1264_v56 = vpop.eup %1263 }
 0xce9   :  { %648 = vrot.lane.b32.xlu1 %v1264_v56, %s1316_s8 }
 0xd5b   :  { %v649_v57 = vpop.permute.xlu1 %648 }
 0xd5c   :  { %v651_v58 = vmul.f32 %v1262_v49, %v649_v57 }
 0xd5e   :  { %653 = vrot.lane.b32.xlu0 %v651_v58, %s1317_s9 }
 0xdd0   :  { %v654_v59 = vpop.permute.xlu0 %653 }
 0xdd1   :  { %1138 = vmatmul.mubr.msk.f32.vlgmr.msra.gmra.mrb[6].mxu0 %vm38_vm0, %v654_v59 }
 0xdd2   :  { %1214 = vmatpush3.bf16.msra.mxu0 %v1364_v8  ;;  %1159 = vmatprep.mubr.msk.f32.mxu0 %vm1314_vm2, %v1315_v13 }
 0xdd3   :  { %1215 = vmatprep.subr.bf16.mxu0 %v1313_v4  ;;  %v739_v4 = vrot.slane %v645_v55, 6 }
 0xdd6   :  { %1217 = vmatpush3.bf16.msra.mxu0 %v1381_v14 }
 0xea4   :  { %v723_v60 = vpop.f32.mrb[6].mxu0 }
 0xea5   :  { %v728_v61 = vrot.slane %v723_v60, 6  ;;  %v1139_v62 = vpop.f32.mrb[7].mxu0 }
 0xea7   :  { %v730_v63 = vadd.f32 %v728_v61, %v1407_v20 }
 0xea9   :  { %1265 = vtanh.f32 %v730_v63  ;;  %v1012_v1 = vmul.f32 -1.442695, %v730_v63 }
 0xeab   :  { %1267 = vpow2.f32 %v1012_v1 }
 0xeb3   :  { %v1266_v0 = vpop.eup %1265 }
 0xeb4   :  { %743 = vrot.lane.b32.xlu1 %v1266_v0, %s1316_s8 }
 0xeb5   :  { %v1268_v2 = vpop.eup %1267 }
 0xeb6   :  { %v734_v8 = vadd.f32 1.0, %v1268_v2 }
 0xeb8   :  { %1269 = vrcp.f32 %v734_v8 }
 0xec2   :  { %v1270_v3 = vpop.eup %1269 }
 0xec3   :  { %v741_v14 = vmul.f32 %v1270_v3, %v739_v4 }
 0xf26   :  { %v744_v13 = vpop.permute.xlu1 %743 }
 0xf27   :  { %v746_v5 = vmul.f32 %v1270_v3, %v744_v13 }
 0xf29   :  { %748 = vrot.lane.b32.xlu0 %v746_v5, %s1317_s9 }
 0xf9b   :  { %v749_v6 = vpop.permute.xlu0 %748 }
 0xf9c   :  { %v751_v7 = vadd.f32 %v749_v6, %v741_v14 }
 0xf9e   :  { %1271 = vtanh.f32 %v751_v7  ;;  %v846_v29 = vrot.slane %v751_v7, 6 }
 0xfa8   :  { %v1272_v9 = vpop.eup %1271 }
 0xfa9   :  { %754 = vrot.lane.b32.xlu1 %v1272_v9, %s1316_s8 }
0x101b   :  { %v755_v10 = vpop.permute.xlu1 %754 }
0x101c   :  { %v757_v11 = vmul.f32 %v1270_v3, %v755_v10 }
0x101e   :  { %v759_v12 = vrot.slane %v757_v11, 2 }
0x1020   :  { %760 = vrot.lane.b32.xlu0 %v759_v12, %s1317_s9 }
0x1092   :  { %v761_v15 = vpop.permute.xlu0 %760 }
0x1093   :  { %1149 = vmatmul.mubr.msk.f32.vlgmr.msra.gmra.mrb[6].mxu1 %vm38_vm0, %v761_v15 }
0x1166   :  { %v830_v16 = vpop.f32.mrb[6].mxu1 }
0x1167   :  { %v835_v17 = vrot.slane %v830_v16, 4  ;;  %v1150_v18 = vpop.f32.mrb[7].mxu1 }
0x1169   :  { %v837_v19 = vadd.f32 %v835_v17, %v1407_v20 }
0x116b   :  { %1273 = vtanh.f32 %v837_v19  ;;  %v1014_v22 = vmul.f32 -1.442695, %v837_v19 }
0x116d   :  { %1275 = vpow2.f32 %v1014_v22 }
0x1175   :  { %v1274_v21 = vpop.eup %1273 }
0x1176   :  { %850 = vrot.lane.b32.xlu1 %v1274_v21, %s1316_s8 }
0x1177   :  { %v1276_v24 = vpop.eup %1275 }
0x1178   :  { %v841_v25 = vadd.f32 1.0, %v1276_v24 }
0x117a   :  { %1277 = vrcp.f32 %v841_v25 }
0x1184   :  { %v1278_v26 = vpop.eup %1277 }
0x1185   :  { %v848_v30 = vmul.f32 %v1278_v26, %v846_v29 }
0x11e8   :  { %v851_v27 = vpop.permute.xlu1 %850 }
0x11e9   :  { %v853_v28 = vmul.f32 %v1278_v26, %v851_v27 }
0x11eb   :  { %855 = vrot.lane.b32.xlu0 %v853_v28, %s1317_s9 }
0x125d   :  { %v856_v31 = vpop.permute.xlu0 %855 }
0x125e   :  { %v858_v32 = vadd.f32 %v856_v31, %v848_v30 }
0x1260   :  { %1279 = vtanh.f32 %v858_v32  ;;  %v953_v48 = vrot.slane %v858_v32, 6 }
0x126a   :  { %v1280_v33 = vpop.eup %1279 }
0x126b   :  { %861 = vrot.lane.b32.xlu1 %v1280_v33, %s1316_s8 }
0x12dd   :  { %v862_v34 = vpop.permute.xlu1 %861 }
0x12de   :  { %v864_v35 = vmul.f32 %v1278_v26, %v862_v34 }
0x12e0   :  { %v866_v36 = vrot.slane %v864_v35, 4 }
0x12e2   :  { %867 = vrot.lane.b32.xlu0 %v866_v36, %s1317_s9 }
0x1354   :  { %v868_v37 = vpop.permute.xlu0 %867 }
0x1355   :  { %1160 = vmatmul.mubr.msk.f32.vlgmr.msra.gmra.mrb[8].mxu0 %vm38_vm0, %v868_v37 }
0x1428   :  { %v937_v23 = vpop.f32.mrb[8].mxu0 }
0x1429   :  { %v942_v38 = vrot.slane %v937_v23, 2  ;;  %v1161_v39 = vpop.f32.mrb[9].mxu0 }
0x142b   :  { %v944_v40 = vadd.f32 %v942_v38, %v1407_v20 }
0x142d   :  { %1281 = vtanh.f32 %v944_v40  ;;  %v1016_v42 = vmul.f32 -1.442695, %v944_v40 }
0x142f   :  { %1283 = vpow2.f32 %v1016_v42 }
0x1437   :  { %v1282_v41 = vpop.eup %1281 }
0x1438   :  { %957 = vrot.lane.b32.xlu1 %v1282_v41, %s1316_s8 }
0x1439   :  { %v1284_v43 = vpop.eup %1283 }
0x143a   :  { %v948_v44 = vadd.f32 1.0, %v1284_v43 }
0x143c   :  { %1285 = vrcp.f32 %v948_v44 }
0x1446   :  { %v1286_v45 = vpop.eup %1285 }
0x1447   :  { %v955_v49 = vmul.f32 %v1286_v45, %v953_v48 }
0x14aa   :  { %v958_v46 = vpop.permute.xlu1 %957 }
0x14ab   :  { %v960_v47 = vmul.f32 %v1286_v45, %v958_v46 }
0x14ad   :  { %962 = vrot.lane.b32.xlu0 %v960_v47, %s1317_s9 }
0x151f   :  { %v963_v50 = vpop.permute.xlu0 %962 }
0x1520   :  { %v965_v51 = vadd.f32 %v963_v50, %v955_v49 }
0x1522   :  { %1287 = vtanh.f32 %v965_v51 }
0x152c   :  { %v1288_v20 = vpop.eup %1287 }
0x152d   :  { %968 = vrot.lane.b32.xlu1 %v1288_v20, %s1316_s8 }
0x1531   :  { %979 = vrot.lane.b32.xlu1 %v965_v51, %s1318_s3 }
0x159f   :  { %v969_v52 = vpop.permute.xlu1 %968 }
0x15a0   :  { %v971_v53 = vmul.f32 %v1286_v45, %v969_v52 }
0x15a2   :  { %973 = vrot.lane.b32.xlu0 %v971_v53, %s1317_s9 }
0x15a3   :  { %v980_v54 = vpop.permute.xlu1 %979 }
0x15a4   :  { %982 = vst.msk [vmem:[#allocation3 - $0x6] sm:$0xc0] %vm976_vm3, %v980_v54 }
0x1614   :  { %v974_v55 = vpop.permute.xlu0 %973 }
0x1615   :  { %977 = vst.msk [vmem:[#allocation2 - $0x6] sm:$0xc0] %vm976_vm3, %v974_v55  ;;  %983 = vst.msk [vmem:[#allocation4 - $0x6] sm:$0xc0] %vm976_vm3, %v974_v55 }
0x1616   :  { %1300 = shalt.err (!%p1297_p4)
}
0x1617   :  { %s1301_s15 = scalar_lea.hbm %s1503_s4, 32 }
0x1618   :  { %p1302_p5 = scmp.ne.s32.totalorder %s1503_s4, %s1301_s15  ;;  %p1305_p6 = scmp.lt.u32.totalorder %s1301_s15, %s1503_s4 }
0x161a   :  { %p1307_p7 = pnand %p1305_p6, %p1302_p5 }
0x161c   :  { %1310 = shalt.err (!%p1307_p7)
}
0x161d   :  { %993 = dma.vmem_to_hbm [thread:$0]  %s991_s11, 32, %s1503_s4, [#allocation5]  }
0x161e   :  { %1311 = dma.done.wait [#allocation5], 32  }
0x161f   :  { %1312 = vsyncadd [#allocation5], 4294967264 }
0x1620   :  { %997 = vsyncpa [#allocation5], 1 }

</bundles_post_ra>
